<compile_context>
chip_gen: v5e
topology: v5e:2x2
jax: 0.10.0
libtpu: 0.0.40
codegen_flags: <defaults>
</compile_context>

<pallas_src>
import functools

import jax
import jax.numpy as jnp
from jax import lax
from jax.experimental import pallas as pl
from jax.experimental.pallas import tpu as pltpu

SLOPE = 0.01       # torch.nn.LeakyReLU default negative_slope
BN_EPS = 1e-5      # torch.nn.BatchNorm3d default eps
LANE = 128
MAX_TILE = 4096    # lane-tile cap (long contiguous DMAs, modest per-tile live values)


def _leaky(x):
    # LeakyReLU with slope in (0, 1) == max(x, slope*x): single VALU op.
    return jnp.maximum(x, SLOPE * x)


def _vmem_capacity_bytes():
    default = 64 * 1024 * 1024          # v7x per-TensorCore VMEM (smallest of the 3 gens)
    try:
        info = pltpu.get_tpu_info()
        cap = int(getattr(info, "vmem_capacity_bytes", default))
        return cap if cap >= 32 * 1024 * 1024 else default
    except Exception:
        return default


def _pick_tile(n, bytes_per_col, vmem_budget, cap=MAX_TILE):
    """Lane tile: multiple of 128, double-buffered fit in vmem_budget, capped at `cap`."""
    t = min(cap, n, max(vmem_budget, 0) // max(2 * bytes_per_col, 1))
    t -= t % LANE
    if t < LANE:
        t = min(n, LANE)
    return t


# --------------------------------------------------------------------------
# Fused kernel: conv -> BN1 -> LeakyReLU -> (global pool -> fc1 -> fc2 -> sigmoid)
#               -> excite -> BN2 -> LeakyReLU, activation resident in VMEM.
# --------------------------------------------------------------------------
def _fused_kernel(x_ref, w_ref, t1_ref, fw1t_ref, fb1_ref, fw2_ref, fb2_ref,
                  s2_ref, t2_ref, out_ref, sum_ref, *, inv_n, tile, nt, n_total):
    """One grid step = (batch b, spatial tile n).

    x_ref:   (Cin, tile) f32     w_ref: (Cout, Cin) f32 (BN1 scale folded in)
    t1_ref:  (Cout, 1)  conv bias + BN1 shift
    fw1t:    (Cout, Cr) fc1.weight.T    fb1: (1, Cr)
    fw2:     (Cout, Cr) fc2.weight      fb2: (Cout, 1)
    s2/t2:   (Cout, 1)  folded BN2 scale / shift
    out_ref: (Cout, N)  resident across the spatial axis (activation stash + final output)
    sum_ref: (Cout, 1)  VMEM scratch: per-channel partial sums for the global avg pool
    """
    n = pl.program_id(1)
    has_tail = (n_total % tile) != 0

    # 1x1x1 conv (one MXU matmul, f32) + BN1 shift + LeakyReLU.
    a = jnp.dot(w_ref[...], x_ref[...], preferred_element_type=jnp.float32)  # (Cout, tile)
    a = _leaky(a + t1_ref[...])

    @pl.when(n == 0)
    def _init():
        sum_ref[...] = jnp.zeros_like(sum_ref)

    if has_tail:
        col = lax.broadcasted_iota(jnp.int32, a.shape, 1)
        valid = (n * tile + col) < n_total
        sum_ref[...] += jnp.sum(jnp.where(valid, a, 0.0), axis=1, keepdims=True)

        tail_w = n_total - (nt - 1) * tile

        @pl.when(n < nt - 1)
        def _stash_full():
            out_ref[:, pl.ds(pl.multiple_of(n * tile, LANE), tile)] = a

        @pl.when(n == nt - 1)
        def _stash_tail():
            out_ref[:, (nt - 1) * tile:n_total] = a[:, :tail_w]
    else:
        sum_ref[...] += jnp.sum(a, axis=1, keepdims=True)
        out_ref[:, pl.ds(pl.multiple_of(n * tile, LANE), tile)] = a

    @pl.when(n == nt - 1)
    def _finalize():
        # SE gate: global average pool -> fc1 -> LeakyReLU -> fc2 -> sigmoid.
        mean = sum_ref[...] * inv_n                                              # (Cout, 1)
        h = _leaky(jnp.sum(fw1t_ref[...] * mean, axis=0, keepdims=True) + fb1_ref[...])
        g = jnp.sum(fw2_ref[...] * h, axis=1, keepdims=True) + fb2_ref[...]      # (Cout, 1)
        gate = 1.0 / (1.0 + jnp.exp(-g))
        scale = gate * s2_ref[...]          # SE gate folded into BN2 scale
        shift = t2_ref[...]

        # Apply gate/BN2/LeakyReLU in place on the resident block, tile-by-tile
        # (bounds vreg live ranges).
        n_full = nt - 1 if has_tail else nt
        if n_full > 0:
            @pl.loop(0, n_full)
            def _apply(j):
                s = pl.multiple_of(j * tile, LANE)
                out_ref[:, pl.ds(s, tile)] = _leaky(out_ref[:, pl.ds(s, tile)] * scale + shift)

        if has_tail:
            lo = (nt - 1) * tile
            out_ref[:, lo:n_total] = _leaky(out_ref[:, lo:n_total] * scale + shift)


# --------------------------------------------------------------------------
# Two-pass fallback (only when the resident (Cout, N) block does not fit VMEM).
# --------------------------------------------------------------------------
def _reduce_kernel(x_ref, w_ref, t1_ref, fw1t_ref, fb1_ref, fw2_ref, fb2_ref,
                   gate_ref, *, inv_n, tile, n_total):
    n = pl.program_id(1)
    a = jnp.dot(w_ref[...], x_ref[...], preferred_element_type=jnp.float32)
    a = _leaky(a + t1_ref[...])

    @pl.when(n == 0)
    def _init():
        gate_ref[...] = jnp.zeros_like(gate_ref)

    if (n_total % tile) != 0:
        col = lax.broadcasted_iota(jnp.int32, a.shape, 1)
        a = jnp.where((n * tile + col) < n_total, a, 0.0)
    gate_ref[...] += jnp.sum(a, axis=1, keepdims=True)

    @pl.when(n == pl.num_programs(1) - 1)
    def _finalize():
        mean = gate_ref[...] * inv_n
        h = _leaky(jnp.sum(fw1t_ref[...] * mean, axis=0, keepdims=True) + fb1_ref[...])
        g = jnp.sum(fw2_ref[...] * h, axis=1, keepdims=True) + fb2_ref[...]
        gate_ref[...] = 1.0 / (1.0 + jnp.exp(-g))


def _apply_kernel(x_ref, w_ref, t1_ref, gs2_ref, t2_ref, out_ref):
    a = jnp.dot(w_ref[...], x_ref[...], preferred_element_type=jnp.float32)
    a = _leaky(a + t1_ref[...])
    out_ref[...] = _leaky(a * gs2_ref[...] + t2_ref[...])   # gate*s2 pre-folded


# --------------------------------------------------------------------------
# Wrapper
# --------------------------------------------------------------------------
@jax.jit
def conv3d_channel_forward(x, params):
    """x: (B, Cin, D, H, W) float32 (PyTorch NCDHW). Returns (B, Cout, D, H, W) float32."""
    B, Cin, D, H, Wd = x.shape
    Cout = params["conv_w"].shape[0]
    Cr = params["fc1_w"].shape[0]
    N = D * H * Wd
    inv_n = 1.0 / N

    xf = x.reshape(B, Cin, N)                                 # contiguous reshape (free)

    # Fold eval-mode BN1 into the conv weight / per-channel shift; fold BN2 into
    # a per-channel scale/shift applied after the SE excitation.
    s1 = params["bn1_gamma"] / jnp.sqrt(params["bn1_var"] + BN_EPS)
    w_fold = params["conv_w"] * s1[:, None]                   # (Cout, Cin)
    t1 = (params["conv_b"] - params["bn1_mean"]) * s1 + params["bn1_beta"]
    s2 = params["bn2_gamma"] / jnp.sqrt(params["bn2_var"] + BN_EPS)
    t2 = params["bn2_beta"] - params["bn2_mean"] * s2
    t1c, s2c, t2c = (v.reshape(Cout, 1) for v in (t1, s2, t2))

    fw1t = params["fc1_w"].T                                  # (Cout, Cr)
    fb1 = params["fc1_b"].reshape(1, Cr)
    fw2 = params["fc2_w"]                                     # (Cout, Cr)
    fb2 = params["fc2_b"].reshape(Cout, 1)

    # Per-generation VMEM budget (v7x: 64 MiB/TC, v5e/v6e: 128 MiB/TC).
    cap = _vmem_capacity_bytes()
    vmem_limit = int(cap * 0.75)
    budget = vmem_limit - (2 << 20)                           # headroom for constants etc.

    w_spec = pl.BlockSpec((Cout, Cin), lambda b, n: (0, 0))
    col_spec = pl.BlockSpec((Cout, 1), lambda b, n: (0, 0))
    fc_spec = pl.BlockSpec((Cout, Cr), lambda b, n: (0, 0))
    fb1_spec = pl.BlockSpec((1, Cr), lambda b, n: (0, 0))

    resident_out = 2 * Cout * N * 4                           # resident out block (+writeback)
    fused_fits = resident_out + 2 * Cin * LANE * 4 <= budget

    if fused_fits:
        tile = _pick_tile(N, Cin * 4, budget - resident_out)
        nt = pl.cdiv(N, tile)
        x_spec = pl.BlockSpec((None, Cin, tile), lambda b, n: (b, 0, n))
        out = pl.pallas_call(
            functools.partial(_fused_kernel, inv_n=inv_n, tile=tile, nt=nt, n_total=N),
            out_shape=jax.ShapeDtypeStruct((B, Cout, N), jnp.float32),
            grid_spec=pltpu.PrefetchScalarGridSpec(
                num_scalar_prefetch=0,
                grid=(B, nt),
                in_specs=[x_spec, w_spec, col_spec, fc_spec, fb1_spec, fc_spec,
                          col_spec, col_spec, col_spec],
                out_specs=pl.BlockSpec((None, Cout, N), lambda b, n: (b, 0, 0)),
                scratch_shapes=[pltpu.VMEM((Cout, 1), jnp.float32)]),
            compiler_params=pltpu.CompilerParams(
                dimension_semantics=("parallel", "arbitrary"),
                vmem_limit_bytes=vmem_limit),
        )(xf, w_fold, t1c, fw1t, fb1, fw2, fb2, s2c, t2c)
        return out.reshape(B, Cout, D, H, Wd)

    # ---- Fallback: two passes (gate reduction, then recompute + apply) ----
    tile = _pick_tile(N, (Cin + Cout) * 4, budget)
    nt = pl.cdiv(N, tile)
    x_spec = pl.BlockSpec((None, Cin, tile), lambda b, n: (b, 0, n))
    gate_spec = pl.BlockSpec((None, Cout, 1), lambda b, n: (b, 0, 0))

    gate = pl.pallas_call(
        functools.partial(_reduce_kernel, inv_n=inv_n, tile=tile, n_total=N),
        out_shape=jax.ShapeDtypeStruct((B, Cout, 1), jnp.float32),
        grid_spec=pltpu.PrefetchScalarGridSpec(
            num_scalar_prefetch=0,
            grid=(B, nt),
            in_specs=[x_spec, w_spec, col_spec, fc_spec, fb1_spec, fc_spec, col_spec],
            out_specs=gate_spec),
        compiler_params=pltpu.CompilerParams(
            dimension_semantics=("parallel", "arbitrary"),
            vmem_limit_bytes=vmem_limit),
    )(xf, w_fold, t1c, fw1t, fb1, fw2, fb2)

    gscale = gate * s2c[None]            # fold SE gate and BN2 scale into one column
    out = pl.pallas_call(
        _apply_kernel,
        out_shape=jax.ShapeDtypeStruct((B, Cout, N), jnp.float32),
        grid_spec=pltpu.PrefetchScalarGridSpec(
            num_scalar_prefetch=0,
            grid=(B, nt),
            in_specs=[x_spec, w_spec, col_spec, gate_spec, col_spec],
            out_specs=pl.BlockSpec((None, Cout, tile), lambda b, n: (b, 0, n))),
        compiler_params=pltpu.CompilerParams(
            dimension_semantics=("parallel", "parallel"),
            vmem_limit_bytes=vmem_limit),
    )(xf, w_fold, t1c, gscale, t2c)
    return out.reshape(B, Cout, D, H, Wd)


# --------------------------------------------------------------------------
# Deterministic parameter construction (PyTorch-shaped tensors)
# --------------------------------------------------------------------------
def init_params(key, c_in, c_out):
    cr = c_out // 8                            # ChannelSELayer reduction_ratio = 8
    ks = jax.random.split(key, 8)

    def bn_params(k, prefix):
        kk = jax.random.split(k, 4)
        return {f"{prefix}_gamma": 1.0 + 0.1 * jax.random.normal(kk[0], (c_out,), jnp.float32),
                f"{prefix}_beta": 0.1 * jax.random.normal(kk[1], (c_out,), jnp.float32),
                f"{prefix}_mean": 0.1 * jax.random.normal(kk[2], (c_out,), jnp.float32),
                f"{prefix}_var": 0.5 + jax.random.uniform(kk[3], (c_out,), jnp.float32)}

    p = dict(
        conv_w=0.2 * jax.random.normal(ks[0], (c_out, c_in), jnp.float32),  # Conv3d 1x1x1
        conv_b=0.1 * jax.random.normal(ks[1], (c_out,), jnp.float32),
        fc1_w=0.3 * jax.random.normal(ks[2], (cr, c_out), jnp.float32),     # Linear weights
        fc1_b=0.1 * jax.random.normal(ks[3], (cr,), jnp.float32),
        fc2_w=0.3 * jax.random.normal(ks[4], (c_out, cr), jnp.float32),
        fc2_b=0.1 * jax.random.normal(ks[5], (c_out,), jnp.float32),
    )
    p.update(bn_params(ks[6], "bn1"))
    p.update(bn_params(ks[7], "bn2"))
    return p


# --------------------------------------------------------------------------
# Pure-JAX reference (f32, HIGHEST matmul precision; correctness check only)
# --------------------------------------------------------------------------
def conv3d_channel_reference(x, p):
    hp = lax.Precision.HIGHEST

    def bn(v, g, b, m, var):
        sc = (g / jnp.sqrt(var + BN_EPS))[None, :, None, None, None]
        return (v - m[None, :, None, None, None]) * sc + b[None, :, None, None, None]

    def leaky(v):
        return jnp.where(v > 0, v, SLOPE * v)

    y = jnp.einsum("oc,bcdhw->bodhw", p["conv_w"], x, precision=hp)
    y = y + p["conv_b"][None, :, None, None, None]
    a = leaky(bn(y, p["bn1_gamma"], p["bn1_beta"], p["bn1_mean"], p["bn1_var"]))
    s = jnp.mean(a, axis=(2, 3, 4))                                        # (B, Cout)
    s = leaky(jnp.dot(s, p["fc1_w"].T, precision=hp) + p["fc1_b"])
    s = jax.nn.sigmoid(jnp.dot(s, p["fc2_w"].T, precision=hp) + p["fc2_b"])
    z = a * s[:, :, None, None, None]
    z = bn(z, p["bn2_gamma"], p["bn2_beta"], p["bn2_mean"], p["bn2_var"])
    return leaky(z)


if __name__ == "__main__":
    B, C_IN, C_OUT = 2, 16, 32       # C_OUT must be a multiple of 8 (SE reduction ratio 8)
    D, H, W = 8, 16, 16              # spatial -> N = 2048 lanes per batch element

    key = jax.random.PRNGKey(0)
    kx, kp = jax.random.split(key)
    x = jax.random.normal(kx, (B, C_IN, D, H, W), jnp.float32)   # NCDHW, like PyTorch
    params = init_params(kp, C_IN, C_OUT)

    out = jax.block_until_ready(conv3d_channel_forward(x, params))
    ref = conv3d_channel_reference(x, params)

    assert out.shape == (B, C_OUT, D, H, W), out.shape
    max_err = float(jnp.max(jnp.abs(out - ref)))
    # Everything (MXU matmul included) is f32 now, so the tolerance is tight.
    assert jnp.allclose(out, ref, rtol=1e-3, atol=1e-3), max_err
    print("KERNEL_OK")
</pallas_src>

<mosaic_0001>
module attributes {stable_mosaic.version = 11 : i64} {
  func.func @_fused_kernel(%arg0: i32, %arg1: i32, %arg2: memref<1x16x2048xf32, #tpu.memory_space<vmem>>, %arg3: memref<32x16xf32, #tpu.memory_space<vmem>>, %arg4: memref<32x1xf32, #tpu.memory_space<vmem>>, %arg5: memref<32x4xf32, #tpu.memory_space<vmem>>, %arg6: memref<1x4xf32, #tpu.memory_space<vmem>>, %arg7: memref<32x4xf32, #tpu.memory_space<vmem>>, %arg8: memref<32x1xf32, #tpu.memory_space<vmem>>, %arg9: memref<32x1xf32, #tpu.memory_space<vmem>>, %arg10: memref<32x1xf32, #tpu.memory_space<vmem>>, %arg11: memref<1x32x2048xf32, #tpu.memory_space<vmem>>, %arg12: memref<32x1xf32, #tpu.memory_space<vmem>>) attributes {dimension_semantics = [#tpu.dimension_semantics<parallel>, #tpu.dimension_semantics<arbitrary>], iteration_bounds = array<i64: 2, 1>, scalar_prefetch = 0 : i64, scratch_operands = 1 : i64, tpu.core_type = #tpu.core_type<tc>, window_params = [{transform_indices = @transform_0, window_bounds = array<i64: 1, 16, 2048>}, {pipeline_mode = #tpu.pipeline_mode<synchronous>, transform_indices = @transform_1, window_bounds = array<i64: 32, 16>}, {pipeline_mode = #tpu.pipeline_mode<synchronous>, transform_indices = @transform_2, window_bounds = array<i64: 32, 1>}, {pipeline_mode = #tpu.pipeline_mode<synchronous>, transform_indices = @transform_3, window_bounds = array<i64: 32, 4>}, {pipeline_mode = #tpu.pipeline_mode<synchronous>, transform_indices = @transform_4, window_bounds = array<i64: 1, 4>}, {pipeline_mode = #tpu.pipeline_mode<synchronous>, transform_indices = @transform_5, window_bounds = array<i64: 32, 4>}, {pipeline_mode = #tpu.pipeline_mode<synchronous>, transform_indices = @transform_6, window_bounds = array<i64: 32, 1>}, {pipeline_mode = #tpu.pipeline_mode<synchronous>, transform_indices = @transform_7, window_bounds = array<i64: 32, 1>}, {pipeline_mode = #tpu.pipeline_mode<synchronous>, transform_indices = @transform_8, window_bounds = array<i64: 32, 1>}, {transform_indices = @transform_9, window_bounds = array<i64: 1, 32, 2048>}]} {
    %c0 = arith.constant 0 : index
    %c0_0 = arith.constant 0 : index
    %0 = vector.load %arg3[%c0, %c0_0] : memref<32x16xf32, #tpu.memory_space<vmem>>, vector<32x16xf32>
    %c0_1 = arith.constant 0 : index
    %c0_2 = arith.constant 0 : index
    %c0_3 = arith.constant 0 : index
    %1 = vector.load %arg2[%c0_1, %c0_2, %c0_3] : memref<1x16x2048xf32, #tpu.memory_space<vmem>>, vector<1x16x2048xf32>
    %2 = vector.shape_cast %1 : vector<1x16x2048xf32> to vector<16x2048xf32>
    %cst = arith.constant dense<0.000000e+00> : vector<32x2048xf32>
    %3 = tpu.matmul %0, %2, %cst {dimension_numbers = #tpu.dot_dimension_numbers<[1], [0], [0], [1], [0, 0, 1, 1], [], []>} : vector<32x16xf32>, vector<16x2048xf32>, vector<32x2048xf32> -> vector<32x2048xf32>
    %c0_4 = arith.constant 0 : index
    %c0_5 = arith.constant 0 : index
    %4 = vector.load %arg4[%c0_4, %c0_5] : memref<32x1xf32, #tpu.memory_space<vmem>>, vector<32x1xf32>
    %5 = vector.broadcast %4 : vector<32x1xf32> to vector<32x2048xf32>
    %6 = arith.addf %3, %5 : vector<32x2048xf32>
    %cst_6 = arith.constant 0.00999999977 : f32
    %7 = vector.broadcast %cst_6 : f32 to vector<32x2048xf32>
    %8 = arith.mulf %7, %6 : vector<32x2048xf32>
    %9 = arith.maximumf %6, %8 : vector<32x2048xf32>
    %c0_i32 = arith.constant 0 : i32
    %10 = arith.cmpi eq, %arg1, %c0_i32 : i32
    %11 = arith.extui %10 : i1 to i32
    %c0_i32_7 = arith.constant 0 : i32
    %12 = arith.cmpi ne, %11, %c0_i32_7 : i32
    scf.if %12 {
      %cst_17 = arith.constant 0.000000e+00 : f32
      %27 = vector.broadcast %cst_17 : f32 to vector<32x1xf32>
      %c0_18 = arith.constant 0 : index
      %c0_19 = arith.constant 0 : index
      %28 = vector.load %arg12[%c0_18, %c0_19] : memref<32x1xf32, #tpu.memory_space<vmem>>, vector<32x1xf32>
      tpu.vector_store %arg12[%c0_18, %c0_19], %27 {strides = array<i32>} : memref<32x1xf32, #tpu.memory_space<vmem>>, vector<32x1xf32>,
    } else {
    }
    %c0_8 = arith.constant 0 : index
    %c0_9 = arith.constant 0 : index
    %13 = vector.load %arg12[%c0_8, %c0_9] : memref<32x1xf32, #tpu.memory_space<vmem>>, vector<32x1xf32>
    %cst_10 = arith.constant dense<0.000000e+00> : vector<32xf32>
    %14 = vector.multi_reduction <add>, %9, %cst_10 [1] : vector<32x2048xf32> to vector<32xf32>
    %15 = vector.shape_cast %14 : vector<32xf32> to vector<32x1xf32>
    %16 = arith.addf %13, %15 : vector<32x1xf32>
    %c0_11 = arith.constant 0 : index
    %c0_12 = arith.constant 0 : index
    %17 = vector.load %arg12[%c0_11, %c0_12] : memref<32x1xf32, #tpu.memory_space<vmem>>, vector<32x1xf32>
    tpu.vector_store %arg12[%c0_11, %c0_12], %16 {strides = array<i32>} : memref<32x1xf32, #tpu.memory_space<vmem>>, vector<32x1xf32>,
    %c2048_i32 = arith.constant 2048 : i32
    %18 = arith.muli %arg1, %c2048_i32 : i32
    %19 = tpu.assume_multiple %18, 128 : i32
    %c0_13 = arith.constant 0 : index
    %c0_14 = arith.constant 0 : index
    %20 = arith.index_cast %19 : i32 to index
    %21 = vector.load %arg11[%c0_13, %c0_14, %20] : memref<1x32x2048xf32, #tpu.memory_space<vmem>>, vector<1x32x2048xf32>
    %22 = vector.shape_cast %21 : vector<1x32x2048xf32> to vector<32x2048xf32>
    %23 = vector.shape_cast %9 : vector<32x2048xf32> to vector<1x32x2048xf32>
    tpu.vector_store %arg11[%c0_13, %c0_14, %20], %23 {strides = array<i32>} : memref<1x32x2048xf32, #tpu.memory_space<vmem>>, vector<1x32x2048xf32>,
    %c0_i32_15 = arith.constant 0 : i32
    %24 = arith.cmpi eq, %arg1, %c0_i32_15 : i32
    %25 = arith.extui %24 : i1 to i32
    %c0_i32_16 = arith.constant 0 : i32
    %26 = arith.cmpi ne, %25, %c0_i32_16 : i32
    scf.if %26 {
      %c0_17 = arith.constant 0 : index
      %c0_18 = arith.constant 0 : index
      %27 = vector.load %arg12[%c0_17, %c0_18] : memref<32x1xf32, #tpu.memory_space<vmem>>, vector<32x1xf32>
      %cst_19 = arith.constant 4.8828125E-4 : f32
      %28 = vector.broadcast %cst_19 : f32 to vector<32x1xf32>
      %29 = arith.mulf %27, %28 : vector<32x1xf32>
      %c0_20 = arith.constant 0 : index
      %c0_21 = arith.constant 0 : index
      %30 = vector.load %arg5[%c0_20, %c0_21] : memref<32x4xf32, #tpu.memory_space<vmem>>, vector<32x4xf32>
      %31 = vector.broadcast %29 : vector<32x1xf32> to vector<32x4xf32>
      %32 = arith.mulf %30, %31 : vector<32x4xf32>
      %cst_22 = arith.constant dense<0.000000e+00> : vector<4xf32>
      %33 = vector.multi_reduction <add>, %32, %cst_22 [0] : vector<32x4xf32> to vector<4xf32>
      %34 = vector.shape_cast %33 : vector<4xf32> to vector<1x4xf32>
      %c0_23 = arith.constant 0 : index
      %c0_24 = arith.constant 0 : index
      %35 = vector.load %arg6[%c0_23, %c0_24] : memref<1x4xf32, #tpu.memory_space<vmem>>, vector<1x4xf32>
      %36 = arith.addf %34, %35 : vector<1x4xf32>
      %cst_25 = arith.constant 0.00999999977 : f32
      %37 = vector.broadcast %cst_25 : f32 to vector<1x4xf32>
      %38 = arith.mulf %37, %36 : vector<1x4xf32>
      %39 = arith.maximumf %36, %38 : vector<1x4xf32>
      %c0_26 = arith.constant 0 : index
      %c0_27 = arith.constant 0 : index
      %40 = vector.load %arg7[%c0_26, %c0_27] : memref<32x4xf32, #tpu.memory_space<vmem>>, vector<32x4xf32>
      %41 = vector.broadcast %39 : vector<1x4xf32> to vector<32x4xf32>
      %42 = arith.mulf %40, %41 : vector<32x4xf32>
      %cst_28 = arith.constant dense<0.000000e+00> : vector<32xf32>
      %43 = vector.multi_reduction <add>, %42, %cst_28 [1] : vector<32x4xf32> to vector<32xf32>
      %44 = vector.shape_cast %43 : vector<32xf32> to vector<32x1xf32>
      %c0_29 = arith.constant 0 : index
      %c0_30 = arith.constant 0 : index
      %45 = vector.load %arg8[%c0_29, %c0_30] : memref<32x1xf32, #tpu.memory_space<vmem>>, vector<32x1xf32>
      %46 = arith.addf %44, %45 : vector<32x1xf32>
      %cst_31 = arith.constant 0.000000e+00 : f32
      %47 = vector.broadcast %cst_31 : f32 to vector<32x1xf32>
      %48 = arith.subf %47, %46 : vector<32x1xf32>
      %49 = math.exp %48 : vector<32x1xf32>
      %cst_32 = arith.constant 1.000000e+00 : f32
      %50 = vector.broadcast %cst_32 : f32 to vector<32x1xf32>
      %51 = arith.addf %50, %49 : vector<32x1xf32>
      %cst_33 = arith.constant 1.000000e+00 : f32
      %52 = vector.broadcast %cst_33 : f32 to vector<32x1xf32>
      %53 = arith.divf %52, %51 : vector<32x1xf32>
      %c0_34 = arith.constant 0 : index
      %c0_35 = arith.constant 0 : index
      %54 = vector.load %arg9[%c0_34, %c0_35] : memref<32x1xf32, #tpu.memory_space<vmem>>, vector<32x1xf32>
      %55 = arith.mulf %53, %54 : vector<32x1xf32>
      %c0_36 = arith.constant 0 : index
      %c0_37 = arith.constant 0 : index
      %56 = vector.load %arg10[%c0_36, %c0_37] : memref<32x1xf32, #tpu.memory_space<vmem>>, vector<32x1xf32>
      %c0_i32_38 = arith.constant 0 : i32
      %c1_i32 = arith.constant 1 : i32
      %57 = arith.muli %c0_i32_38, %c1_i32 : i32
      %c0_i32_39 = arith.constant 0 : i32
      %58 = arith.addi %c0_i32_39, %57 : i32
      %c2048_i32_40 = arith.constant 2048 : i32
      %59 = arith.muli %58, %c2048_i32_40 : i32
      %60 = tpu.assume_multiple %59, 128 : i32
      %c0_41 = arith.constant 0 : index
      %c0_42 = arith.constant 0 : index
      %61 = arith.index_cast %60 : i32 to index
      %62 = vector.load %arg11[%c0_41, %c0_42, %61] : memref<1x32x2048xf32, #tpu.memory_space<vmem>>, vector<1x32x2048xf32>
      %63 = vector.shape_cast %62 : vector<1x32x2048xf32> to vector<32x2048xf32>
      %64 = vector.broadcast %55 : vector<32x1xf32> to vector<32x2048xf32>
      %65 = arith.mulf %63, %64 : vector<32x2048xf32>
      %66 = vector.broadcast %56 : vector<32x1xf32> to vector<32x2048xf32>
      %67 = arith.addf %65, %66 : vector<32x2048xf32>
      %cst_43 = arith.constant 0.00999999977 : f32
      %68 = vector.broadcast %cst_43 : f32 to vector<32x2048xf32>
      %69 = arith.mulf %68, %67 : vector<32x2048xf32>
      %70 = arith.maximumf %67, %69 : vector<32x2048xf32>
      %c0_44 = arith.constant 0 : index
      %c0_45 = arith.constant 0 : index
      %71 = arith.index_cast %60 : i32 to index
      %72 = vector.load %arg11[%c0_44, %c0_45, %71] : memref<1x32x2048xf32, #tpu.memory_space<vmem>>, vector<1x32x2048xf32>
      %73 = vector.shape_cast %72 : vector<1x32x2048xf32> to vector<32x2048xf32>
      %74 = vector.shape_cast %70 : vector<32x2048xf32> to vector<1x32x2048xf32>
      tpu.vector_store %arg11[%c0_44, %c0_45, %71], %74 {strides = array<i32>} : memref<1x32x2048xf32, #tpu.memory_space<vmem>>, vector<1x32x2048xf32>,
      %c1_i32_46 = arith.constant 1 : i32
    } else {
    }
    return
  }
  func.func @transform_0(%arg0: i32, %arg1: i32) -> (i32, i32, i32) {
    %c0_i32 = arith.constant 0 : i32
    %c0_i32_0 = arith.constant 0 : i32
    return %arg0, %c0_i32, %arg1 : i32, i32, i32
  }
  func.func @transform_1(%arg0: i32, %arg1: i32) -> (i32, i32) {
    %c0_i32 = arith.constant 0 : i32
    %c0_i32_0 = arith.constant 0 : i32
    %c0_i32_1 = arith.constant 0 : i32
    return %c0_i32, %c0_i32_0 : i32, i32
  }
  func.func @transform_2(%arg0: i32, %arg1: i32) -> (i32, i32) {
    %c0_i32 = arith.constant 0 : i32
    %c0_i32_0 = arith.constant 0 : i32
    %c0_i32_1 = arith.constant 0 : i32
    return %c0_i32, %c0_i32_0 : i32, i32
  }
  func.func @transform_3(%arg0: i32, %arg1: i32) -> (i32, i32) {
    %c0_i32 = arith.constant 0 : i32
    %c0_i32_0 = arith.constant 0 : i32
    %c0_i32_1 = arith.constant 0 : i32
    return %c0_i32, %c0_i32_0 : i32, i32
  }
  func.func @transform_4(%arg0: i32, %arg1: i32) -> (i32, i32) {
    %c0_i32 = arith.constant 0 : i32
    %c0_i32_0 = arith.constant 0 : i32
    %c0_i32_1 = arith.constant 0 : i32
    return %c0_i32, %c0_i32_0 : i32, i32
  }
  func.func @transform_5(%arg0: i32, %arg1: i32) -> (i32, i32) {
    %c0_i32 = arith.constant 0 : i32
    %c0_i32_0 = arith.constant 0 : i32
    %c0_i32_1 = arith.constant 0 : i32
    return %c0_i32, %c0_i32_0 : i32, i32
  }
  func.func @transform_6(%arg0: i32, %arg1: i32) -> (i32, i32) {
    %c0_i32 = arith.constant 0 : i32
    %c0_i32_0 = arith.constant 0 : i32
    %c0_i32_1 = arith.constant 0 : i32
    return %c0_i32, %c0_i32_0 : i32, i32
  }
  func.func @transform_7(%arg0: i32, %arg1: i32) -> (i32, i32) {
    %c0_i32 = arith.constant 0 : i32
    %c0_i32_0 = arith.constant 0 : i32
    %c0_i32_1 = arith.constant 0 : i32
    return %c0_i32, %c0_i32_0 : i32, i32
  }
  func.func @transform_8(%arg0: i32, %arg1: i32) -> (i32, i32) {
    %c0_i32 = arith.constant 0 : i32
    %c0_i32_0 = arith.constant 0 : i32
    %c0_i32_1 = arith.constant 0 : i32
    return %c0_i32, %c0_i32_0 : i32, i32
  }
  func.func @transform_9(%arg0: i32, %arg1: i32) -> (i32, i32, i32) {
    %c0_i32 = arith.constant 0 : i32
    %c0_i32_0 = arith.constant 0 : i32
    %c0_i32_1 = arith.constant 0 : i32
    return %arg0, %c0_i32, %c0_i32_0 : i32, i32, i32
  }
}

</mosaic_0001>

<bundles_post_ra>
// kernel: conv3d_channel_forward.1
= control target key start
LH: loop header
LB: loop body
LE: loop exit
PB: predicated region body
PF: predicated region fallthrough
CT: control target
= control target key end

     0   :  { %s2052_s30 = smov 0   ;;  %s2054_s10 = smov 0   ;;  %s2943_s0 = inlined_call_operand.vmem [shape: f32[2,16,2048], index: 0, kind: input, shape index: {}]   ;;  %s2944_s1 = inlined_call_operand.vmem [shape: f32[32,16], index: 1, kind: input, shape index: {}]   ;;  %s2945_s2 = inlined_call_operand.vmem [shape: f32[32,1], index: 2, kind: input, shape index: {}]   ;;  %s2946_s3 = inlined_call_operand.vmem [shape: f32[32,4], index: 3, kind: input, shape index: {}]   ;;  %s2947_s4 = inlined_call_operand.vmem [shape: f32[1,4], index: 4, kind: input, shape index: {}]   ;;  %s2948_s5 = inlined_call_operand.vmem [shape: f32[32,4], index: 5, kind: input, shape index: {}]   ;;  %s2949_s6 = inlined_call_operand.vmem [shape: f32[32,1], index: 6, kind: input, shape index: {}]   ;;  %s2950_s7 = inlined_call_operand.vmem [shape: f32[32,1], index: 7, kind: input, shape index: {}]   ;;  %s2951_s8 = inlined_call_operand.vmem [shape: f32[32,1], index: 8, kind: input, shape index: {}]   ;;  %s2952_s9 = inlined_call_operand.vmem [shape: f32[2,32,2048], index: 9, kind: output, shape index: {}]  }
   0x1   :  { %s2056_s11 = smov 0  }
   0x2 LB: > { %s31_s12 = sadd.s32 1, %s1994_s10  ;;  %p1858_p0 = scmp.ge.s32.totalorder %s1998_s11, 1  ;;  %s1998_s11 = sphi %s2056_s11, %s19_s11   ;;  %s1994_s10 = sphi %s2054_s10, %s3032_s10   ;;  %s1990_s30 = sphi %s2052_s30, %s3031_s30  }
   0x3   : > { %p33_p1 = scmp.ge.s32.totalorder %s31_s12, 2  ;;  %p306_p2 = scmp.lt.s32.totalorder %s1998_s11, 3 }
   0x5   : > { %s3034_s12 = smov (%p33_p1, %s31_s12), 0  ;;  %p307_p3 = pnand %p1858_p0, %p306_p2 }
   0x7   : > { %310 = sbr.rel (%p307_p3) target bundleno = 873 (0x369), region = 56 }
   0xc   : > { %p347_p4 = scmp.lt.s32.totalorder %s1990_s30, 1  ;;  %v397_v0 = vld [vmem:[%s2945_s2] sm:$0xff]  ;;  %v2000_v1 = vmov 0   ;;  %v399_v2 = vld [vmem:[%s2945_s2 + $0x10] sm:$0xff]  ;;  %vm421_vm0 = vcmask 130048   ;;  %v398_v19 = vld [vmem:[%s2945_s2 + $0x8] sm:$0xff] }
   0xd   : > { %1957 = vset.pattern.permute.xlu0 %v2000_v1  ;;  %1958 = vset.pattern.permute.xlu1 %v2000_v1  ;;  %v2095_v11 = vld [vmem:[%s2944_s1] sm:$0xff]  ;;  %v2122_v24 = vld [vmem:[%s2944_s1 + $0x8] sm:$0xff]  ;;  %v400_v25 = vld [vmem:[%s2945_s2 + $0x18] sm:$0xff]  ;;  %vm1030_vm1 = vcmask 7168   ;;  %vm1224_vm2 = vcmask 31744  }
   0xe   : > { %s3036_s30 = smov (!%p347_p4, %s1990_s30), 1  ;;  %403 = vperm.xlu0 %1957, %v397_v0   ;;  %1959 = vset.pattern.permute.xlu2 %v2000_v1  ;;  %v2139_v27 = vld [vmem:[%s2944_s1 + $0x10] sm:$0xff]  ;;  %v2156_v32 = vld [vmem:[%s2944_s1 + $0x18] sm:$0xff] }
   0xf   : > { %s1929_s15 = sshll.u32 %s3036_s30, 8  ;;  %413 = vperm.xlu1 %1958, %v399_v2   ;;  %s1930_s24 = sshll.u32 %s3036_s30, 9 }
  0x10   : > { %s2082_s20 = scalar_lea.vmem %s2943_s0, %s1929_s15  ;;  %s2713_s30 = scalar_lea.vmem %s2952_s9, %s1930_s24 }
  0x11   : > { %v381_v3 = vld [vmem:[%s2082_s20 + $0x80] sm:$0xff]  ;;  %v382_v4 = vld [vmem:[%s2082_s20 + $0x88] sm:$0xff]  ;;  %v383_v5 = vld [vmem:[%s2082_s20 + $0x90] sm:$0xff] }
  0x12   : > { %448 = vmatpush.msra.mxu0 %v381_v3  ;;  %477 = vmatpush.msra.mxu1 %v382_v4  ;;  %v384_v6 = vld [vmem:[%s2082_s20 + $0x98] sm:$0xff]  ;;  %v365_v7 = vld [vmem:[%s2082_s20] sm:$0xff]  ;;  %v366_v8 = vld [vmem:[%s2082_s20 + $0x8] sm:$0xff] }
  0x13   : > { %506 = vmatpush.msra.mxu2 %v383_v5  ;;  %535 = vmatpush.msra.mxu3 %v384_v6  ;;  %v367_v9 = vld [vmem:[%s2082_s20 + $0x10] sm:$0xff]  ;;  %v368_v10 = vld [vmem:[%s2082_s20 + $0x18] sm:$0xff]  ;;  %v385_v13 = vld [vmem:[%s2082_s20 + $0xa0] sm:$0xff] }
  0x14   : > { %449 = vmatpush.msra.mxu0 %v365_v7  ;;  %478 = vmatpush.msra.mxu1 %v366_v8  ;;  %v387_v12 = vld [vmem:[%s2082_s20 + $0xb0] sm:$0xff]  ;;  %v388_v14 = vld [vmem:[%s2082_s20 + $0xb8] sm:$0xff]  ;;  %v386_v15 = vld [vmem:[%s2082_s20 + $0xa8] sm:$0xff] }
  0x15   : > { %507 = vmatpush.msra.mxu2 %v367_v9  ;;  %536 = vmatpush.msra.mxu3 %v368_v10  ;;  %v371_v16 = vld [vmem:[%s2082_s20 + $0x30] sm:$0xff]  ;;  %v369_v17 = vld [vmem:[%s2082_s20 + $0x20] sm:$0xff]  ;;  %v372_v18 = vld [vmem:[%s2082_s20 + $0x38] sm:$0xff] }
  0x16   : > { %1863 = vmatmul.msk.f32.vlgmr.msra.gmra.mxu0 %vm421_vm0, %v2095_v11  ;;  %1867 = vmatmul.msk.f32.vlgmr.msra.gmra.mxu1 %vm421_vm0, %v2095_v11  ;;  %v370_v20 = vld [vmem:[%s2082_s20 + $0x28] sm:$0xff]  ;;  %v391_v21 = vld [vmem:[%s2082_s20 + $0xd0] sm:$0xff]  ;;  %v389_v22 = vld [vmem:[%s2082_s20 + $0xc0] sm:$0xff] }
  0x17   : > { %1871 = vmatmul.msk.f32.vlgmr.msra.gmra.mxu2 %vm421_vm0, %v2095_v11  ;;  %1875 = vmatmul.msk.f32.vlgmr.msra.gmra.mxu3 %vm421_vm0, %v2095_v11  ;;  %v392_v23 = vld [vmem:[%s2082_s20 + $0xd8] sm:$0xff]  ;;  %v390_v26 = vld [vmem:[%s2082_s20 + $0xc8] sm:$0xff]  ;;  %v375_v28 = vld [vmem:[%s2082_s20 + $0x50] sm:$0xff] }
  0x18   : > { %622 = vmatpush.msrb.mxu2 %v387_v12  ;;  %564 = vmatpush.msrb.mxu0 %v385_v13  ;;  %v373_v29 = vld [vmem:[%s2082_s20 + $0x40] sm:$0xff]  ;;  %v376_v30 = vld [vmem:[%s2082_s20 + $0x58] sm:$0xff]  ;;  %v374_v31 = vld [vmem:[%s2082_s20 + $0x48] sm:$0xff] }
  0x19   : > { %651 = vmatpush.msrb.mxu3 %v388_v14  ;;  %593 = vmatpush.msrb.mxu1 %v386_v15  ;;  %v395_v33 = vld [vmem:[%s2082_s20 + $0xf0] sm:$0xff]  ;;  %v393_v34 = vld [vmem:[%s2082_s20 + $0xe0] sm:$0xff]  ;;  %v396_v35 = vld [vmem:[%s2082_s20 + $0xf8] sm:$0xff] }
  0x1a   : > { %623 = vmatpush.msrb.mxu2 %v371_v16  ;;  %565 = vmatpush.msrb.mxu0 %v369_v17  ;;  %v394_v36 = vld [vmem:[%s2082_s20 + $0xe8] sm:$0xff]  ;;  %v379_v37 = vld [vmem:[%s2082_s20 + $0x70] sm:$0xff]  ;;  %v377_v38 = vld [vmem:[%s2082_s20 + $0x60] sm:$0xff] }
  0x1b   : > { %652 = vmatpush.msrb.mxu3 %v372_v18  ;;  %408 = vperm.xlu0 %1957, %v398_v19   ;;  %v380_v39 = vld [vmem:[%s2082_s20 + $0x78] sm:$0xff]  ;;  %v378_v40 = vld [vmem:[%s2082_s20 + $0x68] sm:$0xff] }
  0x1c   : > { %594 = vmatpush.msrb.mxu1 %v370_v20  ;;  %738 = vmatpush.msra.mxu2 %v391_v21 }
  0x1d   : > { %680 = vmatpush.msra.mxu0 %v389_v22  ;;  %767 = vmatpush.msra.mxu3 %v392_v23 }
  0x1e   : > { %1864 = vmatmul.msk.f32.gmra.mxu0 %vm421_vm0, %v2122_v24  ;;  %1868 = vmatmul.msk.f32.gmra.mxu1 %vm421_vm0, %v2122_v24 }
  0x1f   : > { %1872 = vmatmul.msk.f32.gmra.mxu2 %vm421_vm0, %v2122_v24  ;;  %1876 = vmatmul.msk.f32.gmra.mxu3 %vm421_vm0, %v2122_v24 }
  0x20   : > { %418 = vperm.xlu1 %1958, %v400_v25   ;;  %709 = vmatpush.msra.mxu1 %v390_v26 }
  0x21   : > { %739 = vmatpush.msra.mxu2 %v375_v28  ;;  %681 = vmatpush.msra.mxu0 %v373_v29 }
  0x22   : > { %768 = vmatpush.msra.mxu3 %v376_v30  ;;  %710 = vmatpush.msra.mxu1 %v374_v31 }
  0x26   : > { %1865 = vmatmul.msk.f32.gmra.mxu0 %vm421_vm0, %v2139_v27  ;;  %1869 = vmatmul.msk.f32.gmra.mxu1 %vm421_vm0, %v2139_v27 }
  0x27   : > { %1873 = vmatmul.msk.f32.gmra.mxu2 %vm421_vm0, %v2139_v27  ;;  %1877 = vmatmul.msk.f32.gmra.mxu3 %vm421_vm0, %v2139_v27 }
  0x2e   : > { %1866 = vmatmul.msk.f32.gmra.mxu0 %vm421_vm0, %v2156_v32  ;;  %1870 = vmatmul.msk.f32.gmra.mxu1 %vm421_vm0, %v2156_v32 }
  0x2f   : > { %1874 = vmatmul.msk.f32.gmra.mxu2 %vm421_vm0, %v2156_v32  ;;  %1878 = vmatmul.msk.f32.gmra.mxu3 %vm421_vm0, %v2156_v32 }
  0x36   : > { %1879 = vmatmul.msk.f32.vlgmr.msrb.gmra.mxu0 %vm421_vm0, %v2095_v11  ;;  %1883 = vmatmul.msk.f32.vlgmr.msrb.gmra.mxu1 %vm421_vm0, %v2095_v11 }
  0x37   : > { %1887 = vmatmul.msk.f32.vlgmr.msrb.gmra.mxu2 %vm421_vm0, %v2095_v11  ;;  %1891 = vmatmul.msk.f32.vlgmr.msrb.gmra.mxu3 %vm421_vm0, %v2095_v11 }
  0x38   : > { %854 = vmatpush.msrb.mxu2 %v395_v33  ;;  %796 = vmatpush.msrb.mxu0 %v393_v34 }
  0x39   : > { %883 = vmatpush.msrb.mxu3 %v396_v35  ;;  %825 = vmatpush.msrb.mxu1 %v394_v36 }
  0x3a   : > { %855 = vmatpush.msrb.mxu2 %v379_v37  ;;  %797 = vmatpush.msrb.mxu0 %v377_v38 }
  0x3b   : > { %884 = vmatpush.msrb.mxu3 %v380_v39  ;;  %826 = vmatpush.msrb.mxu1 %v378_v40 }
  0x3e   : > { %1880 = vmatmul.msk.f32.gmra.mxu0 %vm421_vm0, %v2122_v24  ;;  %1884 = vmatmul.msk.f32.gmra.mxu1 %vm421_vm0, %v2122_v24 }
  0x3f   : > { %1888 = vmatmul.msk.f32.gmra.mxu2 %vm421_vm0, %v2122_v24  ;;  %1892 = vmatmul.msk.f32.gmra.mxu3 %vm421_vm0, %v2122_v24 }
  0x46   : > { %1881 = vmatmul.msk.f32.gmra.mxu0 %vm421_vm0, %v2139_v27  ;;  %1885 = vmatmul.msk.f32.gmra.mxu1 %vm421_vm0, %v2139_v27 }
  0x47   : > { %1889 = vmatmul.msk.f32.gmra.mxu2 %vm421_vm0, %v2139_v27  ;;  %1893 = vmatmul.msk.f32.gmra.mxu3 %vm421_vm0, %v2139_v27 }
  0x4e   : > { %1882 = vmatmul.msk.f32.gmra.mxu0 %vm421_vm0, %v2156_v32  ;;  %1886 = vmatmul.msk.f32.gmra.mxu1 %vm421_vm0, %v2156_v32 }
  0x4f   : > { %1890 = vmatmul.msk.f32.gmra.mxu2 %vm421_vm0, %v2156_v32  ;;  %1894 = vmatmul.msk.f32.gmra.mxu3 %vm421_vm0, %v2156_v32 }
  0x56   : > { %1895 = vmatmul.msk.f32.vlgmr.msra.gmra.mxu0 %vm421_vm0, %v2095_v11  ;;  %1899 = vmatmul.msk.f32.vlgmr.msra.gmra.mxu1 %vm421_vm0, %v2095_v11 }
  0x57   : > { %1903 = vmatmul.msk.f32.vlgmr.msra.gmra.mxu2 %vm421_vm0, %v2095_v11  ;;  %1907 = vmatmul.msk.f32.vlgmr.msra.gmra.mxu3 %vm421_vm0, %v2095_v11 }
  0x5e   : > { %1896 = vmatmul.msk.f32.gmra.mxu0 %vm421_vm0, %v2122_v24  ;;  %1900 = vmatmul.msk.f32.gmra.mxu1 %vm421_vm0, %v2122_v24 }
  0x5f   : > { %1904 = vmatmul.msk.f32.gmra.mxu2 %vm421_vm0, %v2122_v24  ;;  %1908 = vmatmul.msk.f32.gmra.mxu3 %vm421_vm0, %v2122_v24 }
  0x66   : > { %1897 = vmatmul.msk.f32.gmra.mxu0 %vm421_vm0, %v2139_v27  ;;  %1901 = vmatmul.msk.f32.gmra.mxu1 %vm421_vm0, %v2139_v27 }
  0x67   : > { %1905 = vmatmul.msk.f32.gmra.mxu2 %vm421_vm0, %v2139_v27  ;;  %1909 = vmatmul.msk.f32.gmra.mxu3 %vm421_vm0, %v2139_v27 }
  0x6e   : > { %1898 = vmatmul.msk.f32.gmra.mxu0 %vm421_vm0, %v2156_v32  ;;  %1902 = vmatmul.msk.f32.gmra.mxu1 %vm421_vm0, %v2156_v32 }
  0x6f   : > { %1906 = vmatmul.msk.f32.gmra.mxu2 %vm421_vm0, %v2156_v32  ;;  %1910 = vmatmul.msk.f32.gmra.mxu3 %vm421_vm0, %v2156_v32 }
  0x76   : > { %1911 = vmatmul.msk.f32.vlgmr.msrb.gmra.mxu0 %vm421_vm0, %v2095_v11  ;;  %1915 = vmatmul.msk.f32.vlgmr.msrb.gmra.mxu1 %vm421_vm0, %v2095_v11 }
  0x77   : > { %1919 = vmatmul.msk.f32.vlgmr.msrb.gmra.mxu2 %vm421_vm0, %v2095_v11  ;;  %1923 = vmatmul.msk.f32.vlgmr.msrb.gmra.mxu3 %vm421_vm0, %v2095_v11 }
  0x7e   : > { %1912 = vmatmul.msk.f32.gmra.mxu0 %vm421_vm0, %v2122_v24  ;;  %1916 = vmatmul.msk.f32.gmra.mxu1 %vm421_vm0, %v2122_v24 }
  0x7f   : > { %1920 = vmatmul.msk.f32.gmra.mxu2 %vm421_vm0, %v2122_v24  ;;  %1924 = vmatmul.msk.f32.gmra.mxu3 %vm421_vm0, %v2122_v24 }
  0x80   : > { %v2280_v63 = vpop.permute.xlu0 %403 }
  0x81   : > { %v2290_v4 = vpop.permute.xlu1 %413 }
  0x86   : > { %1913 = vmatmul.msk.f32.gmra.mxu0 %vm421_vm0, %v2139_v27  ;;  %1917 = vmatmul.msk.f32.gmra.mxu1 %vm421_vm0, %v2139_v27 }
  0x87   : > { %1921 = vmatmul.msk.f32.gmra.mxu2 %vm421_vm0, %v2139_v27  ;;  %1925 = vmatmul.msk.f32.gmra.mxu3 %vm421_vm0, %v2139_v27 }
  0x8d   : > { %v2303_v12 = vpop.permute.xlu0 %408 }
  0x8e   : > { %1914 = vmatmul.msk.f32.gmra.mxu0 %vm421_vm0, %v2156_v32  ;;  %1918 = vmatmul.msk.f32.gmra.mxu1 %vm421_vm0, %v2156_v32 }
  0x8f   : > { %1922 = vmatmul.msk.f32.gmra.mxu2 %vm421_vm0, %v2156_v32  ;;  %1926 = vmatmul.msk.f32.gmra.mxu3 %vm421_vm0, %v2156_v32 }
  0x92   : > { %v2327_v33 = vpop.permute.xlu1 %418 }
  0x93   : > { %v451_v41 = vpop.f32.mrf.mxu0  ;;  %v480_v42 = vpop.f32.mrf.mxu1 }
  0x94   : > { %v452_v5 = vadd.f32 %v451_v41, %v2280_v63  ;;  %v481_v6 = vadd.f32 %v480_v42, %v2280_v63 }
  0x96   : > { %v898_v13 = vmul.f32 0.01, %v452_v5  ;;  %v899_v14 = vmul.f32 0.01, %v481_v6 }
  0x98   : > { %v2307_v18 = vmax.f32 %v452_v5, %v898_v13  ;;  %v2309_v19 = vmax.f32 %v481_v6, %v899_v14 }
  0x9a   : > { %v509_v43 = vpop.f32.mrf.mxu2  ;;  %v538_v44 = vpop.f32.mrf.mxu3  ;;  %v1039_v35 = vadd.f32 %v2309_v19, %v2307_v18 }
  0x9b   : > { %v454_v45 = vpop.f32.mrf.mxu0  ;;  %v483_v46 = vpop.f32.mrf.mxu1  ;;  %v510_v11 = vadd.f32 %v509_v43, %v2280_v63  ;;  %v539_v20 = vadd.f32 %v538_v44, %v2280_v63 }
  0x9c   : > { %v455_v15 = vadd.f32 %v454_v45, %v2303_v12  ;;  %v484_v17 = vadd.f32 %v483_v46, %v2303_v12 }
  0x9d   : > { %v900_v16 = vmul.f32 0.01, %v510_v11  ;;  %v901_v36 = vmul.f32 0.01, %v539_v20 }
  0x9e   : > { %v914_v24 = vmul.f32 0.01, %v455_v15  ;;  %v915_v30 = vmul.f32 0.01, %v484_v17 }
  0x9f   : > { %v2323_v29 = vmax.f32 %v510_v11, %v900_v16 }
  0xa0   : > { %v2332_v38 = vmax.f32 %v455_v15, %v914_v24  ;;  %v2335_v42 = vmax.f32 %v484_v17, %v915_v30 }
  0xa1   : > { %v1040_v41 = vadd.f32 %v1039_v35, %v2323_v29 }
  0xa2   : > { %v512_v47 = vpop.f32.mrf.mxu2  ;;  %v541_v48 = vpop.f32.mrf.mxu3  ;;  %2979 = vst [vmem:[#allocation3_spill] sm:$0xff] %v2332_v38 }
  0xa3   : > { %v457_v49 = vpop.f32.mrf.mxu0  ;;  %v486_v50 = vpop.f32.mrf.mxu1  ;;  %v513_v21 = vadd.f32 %v512_v47, %v2303_v12  ;;  %v542_v31 = vadd.f32 %v541_v48, %v2303_v12  ;;  %2980 = vst [vmem:[#allocation4_spill] sm:$0xff] %v2335_v42 }
  0xa4   : > { %v458_v25 = vadd.f32 %v457_v49, %v2290_v4  ;;  %v487_v26 = vadd.f32 %v486_v50, %v2290_v4  ;;  %v2340_v49 = vmax.f32 %v539_v20, %v901_v36 }
  0xa5   : > { %v916_v37 = vmul.f32 0.01, %v513_v21  ;;  %v917_v45 = vmul.f32 0.01, %v542_v31 }
  0xa6   : > { %v930_v39 = vmul.f32 0.01, %v458_v25  ;;  %v931_v40 = vmul.f32 0.01, %v487_v26  ;;  %v1041_v14 = vadd.f32 %v1040_v41, %v2340_v49 }
  0xa7   : > { %v2342_v50 = vmax.f32 %v513_v21, %v916_v37  ;;  %v2361_v17 = vmax.f32 %v542_v31, %v917_v45 }
  0xa8   : > { %v2349_v6 = vmax.f32 %v458_v25, %v930_v39 }
  0xa9   : > { %2981 = vst [vmem:[#allocation5_spill] sm:$0xff] %v2342_v50 }
  0xaa   : > { %v515_v51 = vpop.f32.mrf.mxu2  ;;  %v2270_v52 = vpop.f32.mrf.mxu3  ;;  %2982 = vst [vmem:[#allocation6_spill] sm:$0xff] %v2361_v17 }
  0xab   : > { %v460_v53 = vpop.f32.mrf.mxu0  ;;  %v489_v54 = vpop.f32.mrf.mxu1  ;;  %v516_v32 = vadd.f32 %v515_v51, %v2290_v4 }
  0xac   : > { %v461_v43 = vadd.f32 %v460_v53, %v2327_v33  ;;  %v490_v44 = vadd.f32 %v489_v54, %v2327_v33  ;;  %v2351_v53 = vmax.f32 %v487_v26, %v931_v40  ;;  %v545_v54 = vadd.f32 %v2270_v52, %v2290_v4 }
  0xad   : > { %v932_v46 = vmul.f32 0.01, %v516_v32 }
  0xae   : > { %v946_v15 = vmul.f32 0.01, %v461_v43  ;;  %v947_v16 = vmul.f32 0.01, %v490_v44  ;;  %v1073_v30 = vadd.f32 %v2351_v53, %v2349_v6  ;;  %v933_v35 = vmul.f32 0.01, %v545_v54 }
  0xaf   : > { %v2363_v20 = vmax.f32 %v516_v32, %v932_v46 }
  0xb0   : > { %v2378_v36 = vmax.f32 %v490_v44, %v947_v16 }
  0xb2   : > { %v2272_v55 = vpop.f32.mrf.mxu2  ;;  %v2274_v56 = vpop.f32.mrf.mxu3 }
  0xb3   : > { %v567_v57 = vpop.f32.mrf.mxu0  ;;  %v596_v58 = vpop.f32.mrf.mxu1  ;;  %v548_v31 = vadd.f32 %v2274_v56, %v2327_v33 }
  0xb4   : > { %v568_v34 = vadd.f32 %v567_v57, %v2280_v63  ;;  %v597_v48 = vadd.f32 %v596_v58, %v2280_v63 }
  0xb6   : > { %v902_v47 = vmul.f32 0.01, %v568_v34  ;;  %v903_v24 = vmul.f32 0.01, %v597_v48 }
  0xb8   : > { %v2365_v21 = vmax.f32 %v568_v34, %v902_v47  ;;  %v2376_v34 = vmax.f32 %v461_v43, %v946_v15  ;;  %v2386_v40 = vmax.f32 %v597_v48, %v903_v24  ;;  %v2395_v47 = vmax.f32 %v545_v54, %v933_v35 }
  0xba   : > { %v625_v59 = vpop.f32.mrf.mxu2  ;;  %v2276_v60 = vpop.f32.mrf.mxu3  ;;  %v1042_v39 = vadd.f32 %v1041_v14, %v2365_v21 }
  0xbb   : > { %v570_v61 = vpop.f32.mrf.mxu0  ;;  %v2278_v62 = vpop.f32.mrf.mxu1  ;;  %v626_v11 = vadd.f32 %v625_v59, %v2280_v63  ;;  %v519_v59 = vadd.f32 %v2272_v55, %v2327_v33  ;;  %v655_v37 = vadd.f32 %v2276_v60, %v2280_v63 }
  0xbc   : > { %v571_v51 = vadd.f32 %v570_v61, %v2303_v12  ;;  %v1056_v61 = vadd.f32 %v2335_v42, %v2332_v38  ;;  %v600_v26 = vadd.f32 %v2278_v62, %v2303_v12  ;;  %v1074_v62 = vadd.f32 %v1073_v30, %v2363_v20 }
  0xbd   : > { %v904_v32 = vmul.f32 0.01, %v626_v11  ;;  %v948_v43 = vmul.f32 0.01, %v519_v59 }
  0xbe   : > { %v1057_v52 = vadd.f32 %v1056_v61, %v2342_v50  ;;  %v918_v25 = vmul.f32 0.01, %v571_v51  ;;  %v919_v45 = vmul.f32 0.01, %v600_v26  ;;  %v1075_v54 = vadd.f32 %v1074_v62, %v2395_v47 }
  0xbf   : > { %v2397_v61 = vmax.f32 %v626_v11, %v904_v32 }
  0xc0   : > { %v1058_v41 = vadd.f32 %v1057_v52, %v2361_v17  ;;  %v2391_v44 = vmax.f32 %v571_v51, %v918_v25  ;;  %v905_v51 = vmul.f32 0.01, %v655_v37  ;;  %v1043_v52 = vadd.f32 %v1042_v39, %v2386_v40 }
  0xc1   : > { %v2414_v35 = vmax.f32 %v600_v26, %v919_v45 }
  0xc2   : > { %v2282_v0 = vpop.f32.mrf.mxu2  ;;  %v2284_v1 = vpop.f32.mrf.mxu3  ;;  %2983 = vst [vmem:[#allocation7_spill] sm:$0xff] %v2391_v44  ;;  %v1059_v30 = vadd.f32 %v1058_v41, %v2391_v44  ;;  %v2423_v50 = vmax.f32 %v655_v37, %v905_v51 }
  0xc3   : > { %v2286_v2 = vpop.f32.mrf.mxu0  ;;  %v2288_v3 = vpop.f32.mrf.mxu1  ;;  %v629_v55 = vadd.f32 %v2282_v0, %v2303_v12  ;;  %v949_v0 = vmul.f32 0.01, %v548_v31  ;;  %v658_v24 = vadd.f32 %v2284_v1, %v2303_v12  ;;  %2984 = vst [vmem:[#allocation8_spill] sm:$0xff] %v2414_v35  ;;  %v1044_v1 = vadd.f32 %v1043_v52, %v2397_v61 }
  0xc4   : > { %v574_v56 = vadd.f32 %v2286_v2, %v2290_v4  ;;  %v1090_v2 = vadd.f32 %v2378_v36, %v2376_v34  ;;  %v603_v25 = vadd.f32 %v2288_v3, %v2290_v4  ;;  %v1060_v45 = vadd.f32 %v1059_v30, %v2414_v35 }
  0xc5   : > { %v920_v16 = vmul.f32 0.01, %v629_v55  ;;  %v2418_v17 = vmax.f32 %v548_v31, %v949_v0  ;;  %v1045_v51 = vadd.f32 %v1044_v1, %v2423_v50 }
  0xc6   : > { %v934_v11 = vmul.f32 0.01, %v574_v56 }
  0xc7   : > { %v2425_v3 = vmax.f32 %v629_v55, %v920_v16 }
  0xc8   : > { %v2428_v26 = vmax.f32 %v574_v56, %v934_v11 }
  0xc9   : > { %2985 = vst [vmem:[#allocation9_spill] sm:$0xff] %v2425_v3  ;;  %v1061_v11 = vadd.f32 %v1060_v45, %v2425_v3 }
  0xca   : > { %v2294_v7 = vpop.f32.mrf.mxu2  ;;  %v2296_v8 = vpop.f32.mrf.mxu3  ;;  %v1076_v35 = vadd.f32 %v1075_v54, %v2428_v26 }
  0xcb   : > { %v2298_v9 = vpop.f32.mrf.mxu0  ;;  %v2300_v10 = vpop.f32.mrf.mxu1  ;;  %v632_v32 = vadd.f32 %v2294_v7, %v2290_v4 }
  0xcc   : > { %v577_v7 = vadd.f32 %v2298_v9, %v2327_v33  ;;  %v606_v37 = vadd.f32 %v2300_v10, %v2327_v33 }
  0xcd   : > { %v936_v0 = vmul.f32 0.01, %v632_v32 }
  0xce   : > { %v950_v1 = vmul.f32 0.01, %v577_v7  ;;  %v951_v42 = vmul.f32 0.01, %v606_v37 }
  0xd0   : > { %v2471_v3 = vmax.f32 %v577_v7, %v950_v1 }
  0xd2   : > { %v2313_v22 = vpop.f32.mrf.mxu2  ;;  %v2315_v23 = vpop.f32.mrf.mxu3  ;;  %2988 = vst [vmem:[#allocation12_spill] sm:$0xff] %v2471_v3 }
  0xd3   : > { %v2319_v27 = vpop.f32.mrf.mxu0  ;;  %v2321_v28 = vpop.f32.mrf.mxu1 }
  0xd4   : > { %v684_v48 = vadd.f32 %v2319_v27, %v2280_v63  ;;  %v2411_v27 = vmax.f32 %v519_v59, %v948_v43  ;;  %v713_v39 = vadd.f32 %v2321_v28, %v2280_v63  ;;  %v921_v59 = vmul.f32 0.01, %v658_v24 }
  0xd5   : > { %v935_v43 = vmul.f32 0.01, %v603_v25  ;;  %v661_v28 = vadd.f32 %v2296_v8, %v2290_v4 }
  0xd6   : > { %v906_v62 = vmul.f32 0.01, %v684_v48  ;;  %v1091_v56 = vadd.f32 %v1090_v2, %v2411_v27  ;;  %v907_v16 = vmul.f32 0.01, %v713_v39  ;;  %v2450_v8 = vmax.f32 %v658_v24, %v921_v59 }
  0xd7   : > { %v2455_v2 = vmax.f32 %v603_v25, %v935_v43  ;;  %v937_v44 = vmul.f32 0.01, %v661_v28 }
  0xd8   : > { %v2443_v9 = vmax.f32 %v684_v48, %v906_v62  ;;  %2986 = vst [vmem:[#allocation10_spill] sm:$0xff] %v2450_v8  ;;  %v2457_v62 = vmax.f32 %v632_v32, %v936_v0  ;;  %v2461_v24 = vmax.f32 %v713_v39, %v907_v16  ;;  %v1092_v54 = vadd.f32 %v1091_v56, %v2418_v17 }
  0xd9   : > { %v1062_v25 = vadd.f32 %v1061_v11, %v2450_v8  ;;  %v1077_v0 = vadd.f32 %v1076_v35, %v2455_v2 }
  0xda   : > { %v2345_v57 = vpop.f32.mrf.mxu2  ;;  %v2347_v5 = vpop.f32.mrf.mxu3  ;;  %v1046_v45 = vadd.f32 %v1045_v51, %v2443_v9  ;;  %v2477_v51 = vmax.f32 %v661_v28, %v937_v44 }
  0xdb   : > { %v686_v58 = vpop.f32.mrf.mxu0  ;;  %v2356_v13 = vpop.f32.mrf.mxu1  ;;  %v742_v31 = vadd.f32 %v2345_v57, %v2280_v63  ;;  %v771_v59 = vadd.f32 %v2347_v5, %v2280_v63  ;;  %v2479_v5 = vmax.f32 %v606_v37, %v951_v42  ;;  %v1078_v35 = vadd.f32 %v1077_v0, %v2457_v62 }
  0xdc   : > { %v687_v41 = vadd.f32 %v686_v58, %v2303_v12  ;;  %v716_v10 = vadd.f32 %v2356_v13, %v2303_v12  ;;  %v1047_v7 = vadd.f32 %v1046_v45, %v2461_v24  ;;  %v1093_v37 = vadd.f32 %v1092_v54, %v2471_v3 }
  0xdd   : > { %v908_v48 = vmul.f32 0.01, %v742_v31  ;;  %2989 = vst [vmem:[#allocation13_spill] sm:$0xff] %v2479_v5  ;;  %v909_v11 = vmul.f32 0.01, %v771_v59 }
  0xde   : > { %v922_v30 = vmul.f32 0.01, %v687_v41  ;;  %v923_v32 = vmul.f32 0.01, %v716_v10 }
  0xdf   : > { %v2475_v39 = vmax.f32 %v742_v31, %v908_v48  ;;  %v664_v48 = vadd.f32 %v2315_v23, %v2327_v33 }
  0xe0   : > { %v2468_v43 = vmax.f32 %v687_v41, %v922_v30  ;;  %v2490_v42 = vmax.f32 %v716_v10, %v923_v32  ;;  %v1079_v32 = vadd.f32 %v1078_v35, %v2477_v51 }
  0xe1   : > { %v1048_v45 = vadd.f32 %v1047_v7, %v2475_v39 }
  0xe2   : > { %v744_v46 = vpop.f32.mrf.mxu2  ;;  %v2393_v60 = vpop.f32.mrf.mxu3  ;;  %2987 = vst [vmem:[#allocation11_spill] sm:$0xff] %v2468_v43  ;;  %v1063_v44 = vadd.f32 %v1062_v25, %v2468_v43 }
  0xe3   : > { %v689_v14 = vpop.f32.mrf.mxu0  ;;  %v2401_v15 = vpop.f32.mrf.mxu1  ;;  %v745_v38 = vadd.f32 %v744_v46, %v2303_v12  ;;  %v635_v46 = vadd.f32 %v2313_v22, %v2327_v33  ;;  %2990 = vst [vmem:[#allocation14_spill] sm:$0xff] %v2490_v42  ;;  %v774_v8 = vadd.f32 %v2393_v60, %v2303_v12  ;;  %v953_v60 = vmul.f32 0.01, %v664_v48 }
  0xe4   : > { %v690_v13 = vadd.f32 %v689_v14, %v2290_v4  ;;  %v719_v56 = vadd.f32 %v2401_v15, %v2290_v4  ;;  %v1064_v54 = vadd.f32 %v1063_v44, %v2490_v42 }
  0xe5   : > { %v924_v14 = vmul.f32 0.01, %v745_v38  ;;  %v952_v1 = vmul.f32 0.01, %v635_v46 }
  0xe6   : > { %v938_v22 = vmul.f32 0.01, %v690_v13  ;;  %v939_v25 = vmul.f32 0.01, %v719_v56 }
  0xe7   : > { %v2498_v0 = vmax.f32 %v745_v38, %v924_v14  ;;  %v1094_v38 = vadd.f32 %v1093_v37, %v2479_v5  ;;  %v2512_v14 = vmax.f32 %v635_v46, %v952_v1 }
  0xe9   : > { %2991 = vst [vmem:[#allocation15_spill] sm:$0xff] %v2498_v0  ;;  %v1065_v35 = vadd.f32 %v1064_v54, %v2498_v0 }
  0xea   : > { %v747_v55 = vpop.f32.mrf.mxu2  ;;  %v2439_v58 = vpop.f32.mrf.mxu3  ;;  %2992 = vst [vmem:[#allocation16_spill] sm:$0xff] %v2512_v14 }
  0xeb   : > { %v2445_v57 = vpop.f32.mrf.mxu0  ;;  %v2447_v52 = vpop.f32.mrf.mxu1  ;;  %v748_v43 = vadd.f32 %v747_v55, %v2290_v4 }
  0xf2   : > { %v2483_v41 = vpop.f32.mrf.mxu2  ;;  %v2485_v16 = vpop.f32.mrf.mxu3 }
  0xf3   : > { %v799_v31 = vpop.f32.mrf.mxu0  ;;  %v828_v30 = vpop.f32.mrf.mxu1 }
  0xf4   : > { %v800_v28 = vadd.f32 %v799_v31, %v2280_v63  ;;  %v829_v15 = vadd.f32 %v828_v30, %v2280_v63  ;;  %v2503_v31 = vmax.f32 %v771_v59, %v909_v11  ;;  %v2505_v30 = vmax.f32 %v690_v13, %v938_v22 }
  0xf5   : > { %v925_v59 = vmul.f32 0.01, %v774_v8  ;;  %v2516_v11 = vmax.f32 %v719_v56, %v939_v25  ;;  %v693_v13 = vadd.f32 %v2445_v57, %v2327_v33 }
  0xf6   : > { %v910_v10 = vmul.f32 0.01, %v800_v28  ;;  %v911_v7 = vmul.f32 0.01, %v829_v15  ;;  %v1049_v3 = vadd.f32 %v1048_v45, %v2503_v31  ;;  %v1080_v44 = vadd.f32 %v1079_v32, %v2505_v30 }
  0xf7   : > { %v777_v32 = vadd.f32 %v2439_v58, %v2290_v4  ;;  %v1095_v58 = vadd.f32 %v1094_v38, %v2512_v14 }
  0xf8   : > { %v2509_v23 = vmax.f32 %v800_v28, %v910_v10  ;;  %v940_v10 = vmul.f32 0.01, %v748_v43  ;;  %v2524_v54 = vmax.f32 %v829_v15, %v911_v7  ;;  %v2533_v15 = vmax.f32 %v664_v48, %v953_v60 }
  0xf9   : > { %v2535_v7 = vmax.f32 %v774_v8, %v925_v59  ;;  %v1081_v38 = vadd.f32 %v1080_v44, %v2516_v11 }
  0xfa   : > { %v857_v22 = vpop.f32.mrf.mxu2  ;;  %v886_v55 = vpop.f32.mrf.mxu3  ;;  %v1050_v28 = vadd.f32 %v1049_v3, %v2509_v23  ;;  %v954_v3 = vmul.f32 0.01, %v693_v13  ;;  %v2542_v42 = vmax.f32 %v748_v43, %v940_v10  ;;  %v941_v43 = vmul.f32 0.01, %v777_v32 }
  0xfb   : > { %v858_v46 = vadd.f32 %v857_v22, %v2280_v63  ;;  %v887_v37 = vadd.f32 %v886_v55, %v2280_v63  ;;  %v802_v1 = vpop.f32.mrf.mxu0  ;;  %v831_v45 = vpop.f32.mrf.mxu1  ;;  %v722_v22 = vadd.f32 %v2447_v52, %v2327_v33  ;;  %v2001_v55 = vmov 0.0   ;;  %2993 = vst [vmem:[#allocation17_spill] sm:$0xff] %v2535_v7 }
  0xfc   : > { %v803_v56 = vadd.f32 %v802_v1, %v2303_v12  ;;  %v832_v25 = vadd.f32 %v831_v45, %v2303_v12  ;;  %1031 = vst.msk [vmem:[#allocation2] sm:$0xff] %vm1030_vm1, %v2001_v55  ;;  %v1051_v45 = vadd.f32 %v1050_v28, %v2524_v54  ;;  %v751_v52 = vadd.f32 %v2483_v41, %v2327_v33 }
  0xfd   : > { %v912_v57 = vmul.f32 0.01, %v858_v46  ;;  %v913_v0 = vmul.f32 0.01, %v887_v37  ;;  %1032 = vst.msk [vmem:[#allocation2 + $0x8] sm:$0xff] %vm1030_vm1, %v2001_v55  ;;  %v1066_v8 = vadd.f32 %v1065_v35, %v2535_v7  ;;  %v2555_v28 = vmax.f32 %v693_v13, %v954_v3 }
  0xfe   : > { %v926_v63 = vmul.f32 0.01, %v803_v56  ;;  %1033 = vst.msk [vmem:[#allocation2 + $0x10] sm:$0xff] %vm1030_vm1, %v2001_v55  ;;  %v927_v48 = vmul.f32 0.01, %v832_v25  ;;  %v1082_v44 = vadd.f32 %v1081_v38, %v2542_v42 }
  0xff   : > { %v2537_v1 = vmax.f32 %v858_v46, %v912_v57  ;;  %v2550_v60 = vmax.f32 %v887_v37, %v913_v0  ;;  %1034 = vst.msk [vmem:[#allocation2 + $0x18] sm:$0xff] %vm1030_vm1, %v2001_v55  ;;  %v955_v46 = vmul.f32 0.01, %v722_v22  ;;  %v1096_v55 = vadd.f32 %v1095_v58, %v2533_v15 }
 0x100   : > { %v2546_v5 = vmax.f32 %v803_v56, %v926_v63  ;;  %v2564_v3 = vmax.f32 %v832_v25, %v927_v48 }
 0x101   : > { %v1052_v59 = vadd.f32 %v1051_v45, %v2537_v1  ;;  %v956_v45 = vmul.f32 0.01, %v751_v52 }
 0x102   : > { %2994 = vst [vmem:[#allocation18_spill] sm:$0xff] %v2546_v5  ;;  %v860_v41 = vpop.f32.mrf.mxu2  ;;  %v889_v10 = vpop.f32.mrf.mxu3  ;;  %v1067_v56 = vadd.f32 %v1066_v8, %v2546_v5 }
 0x103   : > { %v861_v57 = vadd.f32 %v860_v41, %v2303_v12  ;;  %v890_v35 = vadd.f32 %v889_v10, %v2303_v12  ;;  %v805_v0 = vpop.f32.mrf.mxu0  ;;  %v834_v37 = vpop.f32.mrf.mxu1  ;;  %v1053_v63 = vadd.f32 %v1052_v59, %v2550_v60  ;;  %2995 = vst [vmem:[#allocation19_spill] sm:$0xff] %v2564_v3  ;;  %v1097_v12 = vadd.f32 %v1096_v55, %v2555_v28 }
 0x104   : > { %v806_v13 = vadd.f32 %v805_v0, %v2290_v4  ;;  %v835_v8 = vadd.f32 %v834_v37, %v2290_v4  ;;  %v2568_v41 = vmax.f32 %v722_v22, %v955_v46  ;;  %v780_v59 = vadd.f32 %v2485_v16, %v2327_v33 }
 0x105   : > { %v928_v7 = vmul.f32 0.01, %v861_v57  ;;  %v929_v14 = vmul.f32 0.01, %v890_v35  ;;  %1054 = vadd.xlane.f32.xlu2 %v1053_v63  ;;  %v2572_v10 = vmax.f32 %v777_v32, %v941_v43  ;;  %v1068_v38 = vadd.f32 %v1067_v56, %v2564_v3 }
 0x106   : > { %2996 = vst [vmem:[#allocation20_spill] sm:$0xff] %v2568_v41  ;;  %v942_v58 = vmul.f32 0.01, %v806_v13  ;;  %v2577_v25 = vmax.f32 %v751_v52, %v956_v45  ;;  %v943_v22 = vmul.f32 0.01, %v835_v8  ;;  %v1098_v16 = vadd.f32 %v1097_v12, %v2568_v41 }
 0x107   : > { %v2575_v0 = vmax.f32 %v861_v57, %v928_v7  ;;  %v1083_v37 = vadd.f32 %v1082_v44, %v2572_v10  ;;  %v2582_v63 = vmax.f32 %v890_v35, %v929_v14  ;;  %v957_v55 = vmul.f32 0.01, %v780_v59 }
 0x108   : > { %2998 = vst [vmem:[#allocation22_spill] sm:$0xff] %v2577_v25  ;;  %v2579_v48 = vmax.f32 %v806_v13, %v942_v58  ;;  %v1099_v14 = vadd.f32 %v1098_v16, %v2577_v25  ;;  %v2592_v13 = vmax.f32 %v835_v8, %v943_v22 }
 0x109   : > { %2997 = vst [vmem:[#allocation21_spill] sm:$0xff] %v2575_v0  ;;  %v1069_v46 = vadd.f32 %v1068_v38, %v2575_v0  ;;  %v2595_v0 = vmax.f32 %v780_v59, %v957_v55 }
 0x10a   : > { %2999 = vst [vmem:[#allocation23_spill] sm:$0xff] %v2582_v63  ;;  %v863_v32 = vpop.f32.mrf.mxu2  ;;  %v892_v43 = vpop.f32.mrf.mxu3  ;;  %v1084_v56 = vadd.f32 %v1083_v37, %v2579_v48 }
 0x10b   : > { %v864_v7 = vadd.f32 %v863_v32, %v2290_v4  ;;  %v893_v52 = vadd.f32 %v892_v43, %v2290_v4  ;;  %v808_v57 = vpop.f32.mrf.mxu0  ;;  %v837_v45 = vpop.f32.mrf.mxu1  ;;  %v1070_v44 = vadd.f32 %v1069_v46, %v2582_v63  ;;  %3000 = vst [vmem:[#allocation24_spill] sm:$0xff] %v2595_v0  ;;  %v1100_v46 = vadd.f32 %v1099_v14, %v2595_v0 }
 0x10c   : > { %v809_v35 = vadd.f32 %v808_v57, %v2327_v33  ;;  %v838_v38 = vadd.f32 %v837_v45, %v2327_v33  ;;  %v1085_v4 = vadd.f32 %v1084_v56, %v2592_v13 }
 0x10d   : > { %v944_v12 = vmul.f32 0.01, %v864_v7  ;;  %v945_v58 = vmul.f32 0.01, %v893_v52  ;;  %1071 = vadd.xlane.f32.xlu2 %v1070_v44 }
 0x10e   : > { %v958_v37 = vmul.f32 0.01, %v809_v35  ;;  %v959_v8 = vmul.f32 0.01, %v838_v38 }
 0x10f   : > { %v2598_v32 = vmax.f32 %v864_v7, %v944_v12  ;;  %v2603_v16 = vmax.f32 %v893_v52, %v945_v58 }
 0x110   : > { %v2600_v43 = vmax.f32 %v809_v35, %v958_v37  ;;  %v2610_v7 = vmax.f32 %v838_v38, %v959_v8  ;;  %v1036_v38 = vld [vmem:[#allocation2 + $0x8] sm:$0xff] }
 0x111   : > { %v1086_v22 = vadd.f32 %v1085_v4, %v2598_v32  ;;  %v1035_v4 = vld [vmem:[#allocation2] sm:$0xff] }
 0x112   : > { %3001 = vst [vmem:[#allocation25_spill] sm:$0xff] %v2600_v43  ;;  %v866_v57 = vpop.f32.mrf.mxu2  ;;  %v895_v63 = vpop.f32.mrf.mxu3  ;;  %v1101_v45 = vadd.f32 %v1100_v46, %v2600_v43 }
 0x113   : > { %v867_v59 = vadd.f32 %v866_v57, %v2327_v33  ;;  %v896_v55 = vadd.f32 %v895_v63, %v2327_v33  ;;  %v1087_v56 = vadd.f32 %v1086_v22, %v2603_v16  ;;  %3002 = vst [vmem:[#allocation26_spill] sm:$0xff] %v2610_v7 }
 0x114   : > { %v1102_v52 = vadd.f32 %v1101_v45, %v2610_v7  ;;  %v1037_v45 = vld [vmem:[#allocation2 + $0x10] sm:$0xff] }
 0x115   : > { %v960_v44 = vmul.f32 0.01, %v867_v59  ;;  %v961_v35 = vmul.f32 0.01, %v896_v55  ;;  %1088 = vadd.xlane.f32.xlu0 %v1087_v56 }
 0x117   : > { %v2613_v14 = vmax.f32 %v867_v59, %v960_v44  ;;  %v2615_v12 = vmax.f32 %v896_v55, %v961_v35  ;;  %v1038_v35 = vld [vmem:[#allocation2 + $0x18] sm:$0xff] }
 0x119   : > { %3003 = vst [vmem:[#allocation27_spill] sm:$0xff] %v2613_v14  ;;  %v1103_v58 = vadd.f32 %v1102_v52, %v2613_v14 }
 0x11a   : > { %3004 = vst [vmem:[#allocation28_spill] sm:$0xff] %v2615_v12 }
 0x11b   : > { %v1104_v37 = vadd.f32 %v1103_v58, %v2615_v12 }
 0x11d   : > { %1105 = vadd.xlane.f32.xlu1 %v1104_v37 }
 0x178   : > { %v1055_v33 = vpop.xlane.xlu2 %1054 }
 0x179   : > { %v1107_v63 = vadd.f32 %v1055_v33, %v1035_v4 }
 0x17b   : > { %1112 = vst.msk [vmem:[#allocation2] sm:$0xff] %vm1030_vm1, %v1107_v63 }
 0x180   : > { %v1072_v46 = vpop.xlane.xlu2 %1071 }
 0x181   : > { %v1108_v8 = vadd.f32 %v1072_v46, %v1036_v38 }
 0x182   : > { %v1188_v22 = vld [vmem:[#allocation2] sm:$0xff] }
 0x183   : > { %1113 = vst.msk [vmem:[#allocation2 + $0x8] sm:$0xff] %vm1030_vm1, %v1108_v8  ;;  %v1192_v57 = vmul.f32 0.00048828125, %v1188_v22  ;;  %v1197_v8 = vld [vmem:[%s2946_s3 + $0x8] sm:$0xff]  ;;  %v1196_v22 = vld [vmem:[%s2946_s3] sm:$0xff] }
 0x185   : > { %1202 = vperm.xlu2 %1959, %v1192_v57   ;;  %v1198_v57 = vld [vmem:[%s2946_s3 + $0x10] sm:$0xff] }
 0x188   : > { %v1089_v59 = vpop.xlane.xlu0 %1088 }
 0x189   : > { %v1109_v55 = vadd.f32 %v1089_v59, %v1037_v45 }
 0x18a   : > { %v1189_v56 = vld [vmem:[#allocation2 + $0x8] sm:$0xff] }
 0x18b   : > { %1114 = vst.msk [vmem:[#allocation2 + $0x10] sm:$0xff] %vm1030_vm1, %v1109_v55  ;;  %v1193_v44 = vmul.f32 0.00048828125, %v1189_v56 }
 0x18d   : > { %1207 = vperm.xlu2 %1959, %v1193_v44  }
 0x190   : > { %v1106_v52 = vpop.xlane.xlu1 %1105 }
 0x191   : > { %v1110_v58 = vadd.f32 %v1106_v52, %v1038_v35  ;;  %v1199_v35 = vld [vmem:[%s2946_s3 + $0x18] sm:$0xff] }
 0x192   : > { %v1190_v37 = vld [vmem:[#allocation2 + $0x10] sm:$0xff] }
 0x193   : > { %1115 = vst.msk [vmem:[#allocation2 + $0x18] sm:$0xff] %vm1030_vm1, %v1110_v58  ;;  %v1194_v4 = vmul.f32 0.00048828125, %v1190_v37 }
 0x195   : > { %1212 = vperm.xlu2 %1959, %v1194_v4  }
 0x19a   : > { %v1191_v33 = vld [vmem:[#allocation2 + $0x18] sm:$0xff] }
 0x19b   : > { %v1195_v63 = vmul.f32 0.00048828125, %v1191_v33 }
 0x19d   : > { %1217 = vperm.xlu2 %1959, %v1195_v63  }
 0x1df   : > { %v1203_v38 = vpop.permute.xlu2 %1202 }
 0x1e0   : > { %v1220_v55 = vmul.f32 %v1203_v38, %v1196_v22 }
 0x1e2   : > { %v1225_v52 = vsel %vm1224_vm2, %v1220_v55, 0.0 }
 0x1e7   : > { %v1208_v46 = vpop.permute.xlu2 %1207 }
 0x1e8   : > { %v1221_v59 = vmul.f32 %v1208_v46, %v1197_v8 }
 0x1ea   : > { %v1226_v44 = vsel %vm1224_vm2, %v1221_v59, 0.0  ;;  %v1238_v59 = vld [vmem:[%s2947_s4] sm:$0x1] }
 0x1eb   : > { %v1227_v37 = vadd.f32 %v1226_v44, %v1225_v52  ;;  %v1244_v44 = vld [vmem:[%s2948_s5 + $0x10] sm:$0xff] }
 0x1ef   : > { %v1213_v45 = vpop.permute.xlu2 %1212 }
 0x1f0   : > { %v1222_v56 = vmul.f32 %v1213_v45, %v1198_v57 }
 0x1f2   : > { %v1228_v58 = vsel %vm1224_vm2, %v1222_v56, 0.0 }
 0x1f3   : > { %v1229_v63 = vadd.f32 %v1228_v58, %v1227_v37 }
 0x1f7   : > { %v1218_v4 = vpop.permute.xlu2 %1217 }
 0x1f8   : > { %v1223_v33 = vmul.f32 %v1218_v4, %v1199_v35  ;;  %v1242_v35 = vld [vmem:[%s2948_s5] sm:$0xff] }
 0x1fa   : > { %v1230_v3 = vsel %vm1224_vm2, %v1223_v33, 0.0 }
 0x1fb   : > { %v1231_v46 = vadd.f32 %v1230_v3, %v1229_v63  ;;  %v1243_v3 = vld [vmem:[%s2948_s5 + $0x8] sm:$0xff]  ;;  %v1245_v63 = vld [vmem:[%s2948_s5 + $0x18] sm:$0xff] }
 0x1fd   : > { %v1232_v38 = vrot.slane %v1231_v46, 4 }
 0x1ff   : > { %v1233_v8 = vadd.f32 %v1232_v38, %v1231_v46 }
 0x201   : > { %v1234_v22 = vrot.slane %v1233_v8, 2 }
 0x203   : > { %v1235_v57 = vadd.f32 %v1234_v22, %v1233_v8  ;;  %v1357_v8 = vld [vmem:[%s2951_s8 + $0x10] sm:$0xff]  ;;  %v1355_v22 = vld [vmem:[%s2951_s8] sm:$0xff] }
 0x205   : > { %v1236_v45 = vrot.slane %v1235_v57, 1 }
 0x207   : > { %v1237_v5 = vadd.f32 %v1236_v45, %v1235_v57  ;;  %v1265_v57 = vld [vmem:[%s2949_s6 + $0x10] sm:$0xff]  ;;  %v1264_v45 = vld [vmem:[%s2949_s6 + $0x8] sm:$0xff] }
 0x209   : > { %v1239_v55 = vadd.f32 %v1238_v59, %v1237_v5  ;;  %v1263_v59 = vld [vmem:[%s2949_s6] sm:$0xff] }
 0x20b   : > { %v1240_v12 = vmul.f32 0.01, %v1239_v55 }
 0x20d   : > { %v1241_v56 = vmax.f32 %v1239_v55, %v1240_v12 }
 0x20f   : > { %v1246_v52 = vperm.slane %v1241_v56, 0 }
 0x211   : > { %v1249_v58 = vmul.f32 %v1246_v52, %v1244_v44  ;;  %v1248_v37 = vmul.f32 %v1246_v52, %v1243_v3  ;;  %v1247_v4 = vmul.f32 %v1246_v52, %v1242_v35  ;;  %v1250_v46 = vmul.f32 %v1246_v52, %v1245_v63  ;;  %v1266_v63 = vld [vmem:[%s2949_s6 + $0x18] sm:$0xff] }
 0x213   : > { %v1257_v5 = vsel %vm1224_vm2, %v1249_v58, 0.0  ;;  %v1254_v12 = vsel %vm1224_vm2, %v1248_v37, 0.0  ;;  %v1251_v33 = vsel %vm1224_vm2, %v1247_v4, 0.0  ;;  %v1260_v38 = vsel %vm1224_vm2, %v1250_v46, 0.0 }
 0x214   : > { %1258 = vadd.xlane.f32.xlu2 %v1257_v5  ;;  %1255 = vadd.xlane.f32.xlu1 %v1254_v12 }
 0x215   : > { %1252 = vadd.xlane.f32.xlu0 %v1251_v33 }
 0x21d   : > { %1261 = vadd.xlane.f32.xlu0 %v1260_v38 }
 0x22c   : > { %1519 = vperm.xlu2 %1959, %v1357_v8  }
 0x22d   : > { %1509 = vperm.xlu1 %1958, %v1355_v22  }
 0x287   : > { %v1259_v55 = vpop.xlane.xlu2 %1258  ;;  %v1256_v56 = vpop.xlane.xlu1 %1255 }
 0x288   : > { %v1269_v44 = vadd.f32 %v1265_v57, %v1259_v55  ;;  %v1268_v3 = vadd.f32 %v1264_v45, %v1256_v56  ;;  %v1253_v35 = vpop.xlane.xlu0 %1252 }
 0x289   : > { %v1267_v52 = vadd.f32 %v1263_v59, %v1253_v35 }
 0x28a   : > { %v1273_v58 = vsub.f32 0.0, %v1269_v44  ;;  %v1272_v37 = vsub.f32 0.0, %v1268_v3 }
 0x28b   : > { %v1271_v4 = vsub.f32 0.0, %v1267_v52 }
 0x28c   : > { %v1279_v5 = vmul.f32 1.442695, %v1273_v58  ;;  %v1277_v12 = vmul.f32 1.442695, %v1272_v37 }
 0x28d   : > { %v1275_v33 = vmul.f32 1.442695, %v1271_v4 }
 0x28e   : > { %1960 = vpow2.f32 %v1279_v5 }
 0x28f   : > { %1962 = vpow2.f32 %v1277_v12 }
 0x290   : > { %1964 = vpow2.f32 %v1275_v33  ;;  %v1262_v46 = vpop.xlane.xlu0 %1261 }
 0x291   : > { %v1270_v38 = vadd.f32 %v1266_v63, %v1262_v46 }
 0x293   : > { %v1274_v8 = vsub.f32 0.0, %v1270_v38 }
 0x294   : > { %v1961_v22 = vpop.eup %1960 }
 0x295   : > { %v1963_v57 = vpop.eup %1962  ;;  %v1285_v45 = vadd.f32 1.0, %v1961_v22  ;;  %v1281_v56 = vmul.f32 1.442695, %v1274_v8 }
 0x296   : > { %v1965_v59 = vpop.eup %1964  ;;  %v1284_v55 = vadd.f32 1.0, %v1963_v57 }
 0x297   : > { %1966 = vrcp.f32 %v1285_v45  ;;  %v1283_v44 = vadd.f32 1.0, %v1965_v59  ;;  %v1328_v25 = vand.u32 2147483648, %v1285_v45  ;;  %vm1322_vm12 = vweird.f32 %v1285_v45 }
 0x298   : > { %1968 = vrcp.f32 %v1284_v55  ;;  %v1311_v46 = vand.u32 2147483647, %v1284_v55  ;;  %v1313_v38 = vand.u32 2147483648, %v1284_v55  ;;  %vm1307_vm5 = vweird.f32 %v1284_v55 }
 0x299   : > { %1970 = vrcp.f32 %v1283_v44  ;;  %v1296_v57 = vand.u32 2147483647, %v1283_v44  ;;  %v1298_v59 = vand.u32 2147483648, %v1283_v44  ;;  %vm1292_vm7 = vweird.f32 %v1283_v44 }
 0x29a   : > { %1972 = vpow2.f32 %v1281_v56  ;;  %v1314_v43 = vor.u32 1.1754944e-38, %v1313_v38  ;;  %vm1312_vm8 = vcmp.eq.f32.partialorder %v1311_v46, 8.507059e+37  ;;  %v1329_v46 = vor.u32 1.1754944e-38, %v1328_v25 }
 0x29b   : > { %vm1297_vm10 = vcmp.eq.f32.partialorder %v1296_v57, 8.507059e+37 }
 0x29d   : > { %v1967_v3 = vpop.eup %1966 }
 0x29e   : > { %v1969_v35 = vpop.eup %1968  ;;  %v1318_v52 = vmul.f32 %v1967_v3, %v1285_v45  ;;  %vm1323_vm11 = vweird.f32 %v1967_v3 }
 0x29f   : > { %v1971_v58 = vpop.eup %1970  ;;  %v1303_v37 = vmul.f32 %v1969_v35, %v1284_v55  ;;  %vm1308_vm3 = vweird.f32 %v1969_v35  ;;  %vm1324_vm13 = vmor %vm1322_vm12, %vm1323_vm11 }
 0x2a0   : > { %v1973_v4 = vpop.eup %1972  ;;  %v1288_v5 = vmul.f32 %v1971_v58, %v1283_v44  ;;  %v1319_v12 = vsub.f32 1.0, %v1318_v52  ;;  %vm1293_vm4 = vweird.f32 %v1971_v58  ;;  %vm1309_vm6 = vmor %vm1307_vm5, %vm1308_vm3  ;;  %v1348_v52 = vld [vmem:[%s2950_s7 + $0x8] sm:$0xff] }
 0x2a1   : > { %v1286_v33 = vadd.f32 1.0, %v1973_v4  ;;  %v1304_v63 = vsub.f32 1.0, %v1303_v37  ;;  %vm1294_vm9 = vmor %vm1292_vm7, %vm1293_vm4 }
 0x2a2   : > { %v1289_v22 = vsub.f32 1.0, %v1288_v5  ;;  %v1320_v56 = vmul.f32 %v1967_v3, %v1319_v12  ;;  %v1299_v5 = vor.u32 1.1754944e-38, %v1298_v59 }
 0x2a3   : > { %1974 = vrcp.f32 %v1286_v33  ;;  %v1305_v8 = vmul.f32 %v1969_v35, %v1304_v63  ;;  %v1347_v63 = vld [vmem:[%s2950_s7] sm:$0xff]  ;;  %v1343_v57 = vand.u32 2147483648, %v1286_v33  ;;  %vm1337_vm0 = vweird.f32 %v1286_v33 }
 0x2a4   : > { %v1290_v14 = vmul.f32 %v1971_v58, %v1289_v22  ;;  %v1321_v55 = vadd.f32 %v1967_v3, %v1320_v56  ;;  %v1349_v56 = vld [vmem:[%s2950_s7 + $0x10] sm:$0xff] }
 0x2a5   : > { %v1306_v7 = vadd.f32 %v1969_v35, %v1305_v8 }
 0x2a6   : > { %v1291_v37 = vadd.f32 %v1971_v58, %v1290_v14  ;;  %v1326_v14 = vand.u32 2147483647, %v1285_v45  ;;  %v1325_v44 = vsel %vm1324_vm13, %v1967_v3, %v1321_v55  ;;  %v1344_v45 = vor.u32 1.1754944e-38, %v1343_v57 }
 0x2a7   : > { %v1310_v4 = vsel %vm1309_vm6, %v1969_v35, %v1306_v7 }
 0x2a8   : > { %v1315_v12 = vsel %vm1312_vm8, %v1314_v43, %v1310_v4  ;;  %v1295_v22 = vsel %vm1294_vm9, %v1971_v58, %v1291_v37  ;;  %vm1327_vm14 = vcmp.eq.f32.partialorder %v1326_v14, 8.507059e+37  ;;  %v1341_v58 = vand.u32 2147483647, %v1286_v33  ;;  %v1358_v4 = vld [vmem:[%s2951_s8 + $0x18] sm:$0xff] }
 0x2a9   : > { %v1975_v38 = vpop.eup %1974  ;;  %v1352_v8 = vmul.f32 %v1348_v52, %v1315_v12  ;;  %v1300_v0 = vsel %vm1297_vm10, %v1299_v5, %v1295_v22  ;;  %v1330_v59 = vsel %vm1327_vm14, %v1329_v46, %v1325_v44  ;;  %v1510_v5 = vpop.permute.xlu1 %1509 }
 0x2aa   : > { %v1351_v41 = vmul.f32 %v1347_v63, %v1300_v0  ;;  %v1333_v7 = vmul.f32 %v1975_v38, %v1286_v33  ;;  %vm1338_vm15 = vweird.f32 %v1975_v38  ;;  %v1353_v3 = vmul.f32 %v1349_v56, %v1330_v59  ;;  %v1356_v33 = vld [vmem:[%s2951_s8 + $0x8] sm:$0xff] }
 0x2ab   : > { %1430 = vperm.xlu0 %1957, %v1352_v8   ;;  %vm1339_vm1 = vmor %vm1337_vm0, %vm1338_vm15  ;;  %vm1342_vm2 = vcmp.eq.f32.partialorder %v1341_v58, 8.507059e+37 }
 0x2ac   : > { %1425 = vperm.xlu1 %1958, %v1351_v41   ;;  %v1334_v35 = vsub.f32 1.0, %v1333_v7  ;;  %v1350_v41 = vld [vmem:[%s2950_s7 + $0x18] sm:$0xff] }
 0x2ae   : > { %v1335_v43 = vmul.f32 %v1975_v38, %v1334_v35 }
 0x2b0   : > { %v1336_v0 = vadd.f32 %v1975_v38, %v1335_v43 }
 0x2b2   : > { %v1340_v25 = vsel %vm1339_vm1, %v1975_v38, %v1336_v0 }
 0x2b3   : > { %v1345_v52 = vsel %vm1342_vm2, %v1344_v45, %v1340_v25 }
 0x2b4   : > { %1435 = vperm.xlu1 %1958, %v1353_v3   ;;  %v1354_v37 = vmul.f32 %v1350_v41, %v1345_v52 }
 0x2b6   : > { %1440 = vperm.xlu0 %1957, %v1354_v37  }
 0x2bc   : > { %1524 = vperm.xlu1 %1958, %v1358_v4  }
 0x2be   : > { %1514 = vperm.xlu0 %1957, %v1356_v33  }
 0x31e   : > { %v1426_v63 = vpop.permute.xlu1 %1425 }
 0x31f   : > { %v1443_v12 = vmul.f32 %v1426_v63, %v2307_v18  ;;  %v1444_v22 = vmul.f32 %v1426_v63, %v2309_v19  ;;  %v1445_v55 = vmul.f32 %v1426_v63, %v2323_v29  ;;  %v1446_v38 = vmul.f32 %v1426_v63, %v2340_v49 }
 0x320   : > { %v1447_v8 = vmul.f32 %v1426_v63, %v2365_v21  ;;  %v1448_v14 = vmul.f32 %v1426_v63, %v2386_v40  ;;  %v1449_v7 = vmul.f32 %v1426_v63, %v2397_v61  ;;  %v1450_v44 = vmul.f32 %v1426_v63, %v2423_v50 }
 0x321   : > { %v1451_v35 = vmul.f32 %v1426_v63, %v2443_v9  ;;  %v1527_v46 = vadd.f32 %v1510_v5, %v1443_v12  ;;  %v1528_v57 = vadd.f32 %v1510_v5, %v1444_v22  ;;  %v1529_v18 = vadd.f32 %v1510_v5, %v1445_v55 }
 0x322   : > { %v1452_v43 = vmul.f32 %v1426_v63, %v2461_v24  ;;  %v1530_v19 = vadd.f32 %v1510_v5, %v1446_v38  ;;  %v1531_v58 = vadd.f32 %v1510_v5, %v1447_v8  ;;  %v1532_v29 = vadd.f32 %v1510_v5, %v1448_v14 }
 0x323   : > { %v1453_v49 = vmul.f32 %v1426_v63, %v2475_v39  ;;  %v1454_v21 = vmul.f32 %v1426_v63, %v2503_v31  ;;  %v1533_v40 = vadd.f32 %v1510_v5, %v1449_v7  ;;  %v1455_v61 = vmul.f32 %v1426_v63, %v2509_v23 }
 0x324   : > { %v1456_v50 = vmul.f32 %v1426_v63, %v2524_v54  ;;  %v1457_v9 = vmul.f32 %v1426_v63, %v2537_v1  ;;  %v1534_v59 = vadd.f32 %v1510_v5, %v1450_v44  ;;  %v1535_v56 = vadd.f32 %v1510_v5, %v1451_v35 }
 0x325   : > { %v1591_v0 = vmul.f32 0.01, %v1527_v46  ;;  %v1592_v45 = vmul.f32 0.01, %v1528_v57  ;;  %v1593_v24 = vmul.f32 0.01, %v1529_v18  ;;  %v1536_v39 = vadd.f32 %v1510_v5, %v1452_v43 }
 0x326   : > { %v1594_v31 = vmul.f32 0.01, %v1530_v19  ;;  %v1595_v41 = vmul.f32 0.01, %v1531_v58  ;;  %v1596_v3 = vmul.f32 0.01, %v1532_v29  ;;  %v1458_v23 = vmul.f32 %v1426_v63, %v2550_v60  ;;  %v2720_v63 = vpop.permute.xlu1 %1435 }
 0x327   : > { %v1537_v54 = vadd.f32 %v1510_v5, %v1453_v49  ;;  %v1597_v1 = vmul.f32 0.01, %v1533_v40  ;;  %v1655_v25 = vmax.f32 %v1527_v46, %v1591_v0  ;;  %v1538_v52 = vadd.f32 %v1510_v5, %v1454_v21 }
 0x328   : > { %v1598_v37 = vmul.f32 0.01, %v1534_v59  ;;  %v1656_v4 = vmax.f32 %v1528_v57, %v1592_v45  ;;  %v1539_v33 = vadd.f32 %v1510_v5, %v1455_v61  ;;  %v2716_v12 = vadd.f32 %v1510_v5, %v1456_v50 }
 0x329   : > { %v1599_v22 = vmul.f32 0.01, %v1535_v56  ;;  %v1657_v55 = vmax.f32 %v1529_v18, %v1593_v24  ;;  %1719 = vst [vmem:[%s2713_s30] sm:$0xff] %v1655_v25  ;;  %v1600_v38 = vmul.f32 0.01, %v1536_v39  ;;  %v1658_v8 = vmax.f32 %v1530_v19, %v1594_v31 }
 0x32a   : > { %v1659_v14 = vmax.f32 %v1531_v58, %v1595_v41  ;;  %v1660_v60 = vmax.f32 %v1532_v29, %v1596_v3  ;;  %1720 = vst [vmem:[%s2713_s30 + $0x8] sm:$0xff] %v1656_v4  ;;  %v1541_v7 = vadd.f32 %v1510_v5, %v1457_v9  ;;  %v1542_v44 = vadd.f32 %v1510_v5, %v1458_v23 }
 0x32b   : > { %v1601_v35 = vmul.f32 0.01, %v1537_v54  ;;  %v1661_v46 = vmax.f32 %v1533_v40, %v1597_v1  ;;  %1721 = vst [vmem:[%s2713_s30 + $0x10] sm:$0xff] %v1657_v55  ;;  %v1602_v57 = vmul.f32 0.01, %v1538_v52  ;;  %v1662_v43 = vmax.f32 %v1534_v59, %v1598_v37 }
 0x32c   : > { %1722 = vst [vmem:[%s2713_s30 + $0x18] sm:$0xff] %v1658_v8  ;;  %v1603_v18 = vmul.f32 0.01, %v1539_v33  ;;  %v1663_v49 = vmax.f32 %v1535_v56, %v1599_v22  ;;  %v1475_v19 = vmul.f32 %v2720_v63, %v2349_v6  ;;  %v1476_v58 = vmul.f32 %v2720_v63, %v2351_v53  ;;  %v1520_v53 = vpop.permute.xlu2 %1519 }
 0x32d   : > { %1723 = vst [vmem:[%s2713_s30 + $0x20] sm:$0xff] %v1659_v14  ;;  %v1604_v5 = vmul.f32 0.01, %v2716_v12  ;;  %v1664_v29 = vmax.f32 %v1536_v39, %v1600_v38  ;;  %v1477_v21 = vmul.f32 %v2720_v63, %v2363_v20  ;;  %v1478_v40 = vmul.f32 %v2720_v63, %v2395_v47  ;;  %v2742_v20 = vpop.permute.xlu0 %1430 }
 0x32e   : > { %1724 = vst [vmem:[%s2713_s30 + $0x28] sm:$0xff] %v1660_v60  ;;  %v1605_v61 = vmul.f32 0.01, %v1541_v7  ;;  %v1606_v50 = vmul.f32 0.01, %v1542_v44  ;;  %v1665_v9 = vmax.f32 %v1537_v54, %v1601_v35  ;;  %v1479_v6 = vmul.f32 %v2720_v63, %v2428_v26 }
 0x32f   : > { %1725 = vst [vmem:[%s2713_s30 + $0x30] sm:$0xff] %v1661_v46  ;;  %v1666_v59 = vmax.f32 %v1538_v52, %v1602_v57  ;;  %v1480_v56 = vmul.f32 %v2720_v63, %v2455_v2  ;;  %v1667_v0 = vmax.f32 %v1539_v33, %v1603_v18  ;;  %v1481_v47 = vmul.f32 %v2720_v63, %v2457_v62 }
 0x330   : > { %1726 = vst [vmem:[%s2713_s30 + $0x38] sm:$0xff] %v1662_v43  ;;  %v1559_v45 = vadd.f32 %v1520_v53, %v1475_v19  ;;  %v1560_v24 = vadd.f32 %v1520_v53, %v1476_v58  ;;  %v1668_v26 = vmax.f32 %v2716_v12, %v1604_v5  ;;  %v1482_v39 = vmul.f32 %v2720_v63, %v2477_v51 }
 0x331   : > { %1727 = vst [vmem:[%s2713_s30 + $0x40] sm:$0xff] %v1663_v49  ;;  %v1561_v31 = vadd.f32 %v1520_v53, %v1477_v21  ;;  %v1562_v41 = vadd.f32 %v1520_v53, %v1478_v40  ;;  %v1669_v2 = vmax.f32 %v1541_v7, %v1605_v61  ;;  %v1670_v3 = vmax.f32 %v1542_v44, %v1606_v50  ;;  %v2780_v50 = vpop.permute.xlu1 %1524 }
 0x332   : > { %1728 = vst [vmem:[%s2713_s30 + $0x48] sm:$0xff] %v1664_v29  ;;  %v1483_v23 = vmul.f32 %v2720_v63, %v2505_v30  ;;  %v1563_v54 = vadd.f32 %v1520_v53, %v1479_v6  ;;  %v1484_v62 = vmul.f32 %v2720_v63, %v2516_v11  ;;  %v1485_v1 = vmul.f32 %v2720_v63, %v2542_v42 }
 0x333   : > { %1729 = vst [vmem:[%s2713_s30 + $0x50] sm:$0xff] %v1665_v9  ;;  %v1486_v51 = vmul.f32 %v2720_v63, %v2572_v10  ;;  %v1564_v25 = vadd.f32 %v1520_v53, %v1480_v56  ;;  %v1487_v52 = vmul.f32 %v2720_v63, %v2579_v48  ;;  %v1565_v37 = vadd.f32 %v1520_v53, %v1481_v47 }
 0x334   : > { %1730 = vst [vmem:[%s2713_s30 + $0x58] sm:$0xff] %v1666_v59  ;;  %v1623_v30 = vmul.f32 0.01, %v1559_v45  ;;  %v1624_v4 = vmul.f32 0.01, %v1560_v24  ;;  %v1488_v33 = vmul.f32 %v2720_v63, %v2592_v13  ;;  %v1566_v11 = vadd.f32 %v1520_v53, %v1482_v39 }
 0x335   : > { %1731 = vst [vmem:[%s2713_s30 + $0x60] sm:$0xff] %v1667_v0  ;;  %v1625_v12 = vmul.f32 0.01, %v1561_v31  ;;  %v1626_v22 = vmul.f32 0.01, %v1562_v41  ;;  %v1489_v42 = vmul.f32 %v2720_v63, %v2598_v32  ;;  %v1567_v10 = vadd.f32 %v1520_v53, %v1483_v23  ;;  %v2773_v19 = vpop.permute.xlu0 %1440 }
 0x336   : > { %1732 = vst [vmem:[%s2713_s30 + $0x68] sm:$0xff] %v1668_v26  ;;  %v1627_v55 = vmul.f32 0.01, %v1563_v54  ;;  %v1687_v38 = vmax.f32 %v1559_v45, %v1623_v30  ;;  %v1490_v48 = vmul.f32 %v2720_v63, %v2603_v16  ;;  %v1568_v8 = vadd.f32 %v1520_v53, %v1484_v62 }
 0x337   : > { %1733 = vst [vmem:[%s2713_s30 + $0x70] sm:$0xff] %v1669_v2  ;;  %v1628_v14 = vmul.f32 0.01, %v1564_v25  ;;  %v1688_v60 = vmax.f32 %v1560_v24, %v1624_v4  ;;  %v1569_v7 = vadd.f32 %v1520_v53, %v1485_v1  ;;  %v1629_v13 = vmul.f32 0.01, %v1565_v37 }
 0x338   : > { %1734 = vst [vmem:[%s2713_s30 + $0x78] sm:$0xff] %v1670_v3  ;;  %v1689_v44 = vmax.f32 %v1561_v31, %v1625_v12  ;;  %v1570_v35 = vadd.f32 %v1520_v53, %v1486_v51  ;;  %v1630_v46 = vmul.f32 0.01, %v1566_v11  ;;  %v1690_v57 = vmax.f32 %v1562_v41, %v1626_v22  ;;  %v3005_v41 = vld [vmem:[#allocation12_spill] sm:$0xff] }
 0x339   : > { %v1571_v32 = vadd.f32 %v1520_v53, %v1487_v52  ;;  %v1572_v43 = vadd.f32 %v1520_v53, %v1488_v33  ;;  %v1631_v18 = vmul.f32 0.01, %v1567_v10  ;;  %v1691_v49 = vmax.f32 %v1563_v54, %v1627_v55  ;;  %1751 = vst [vmem:[%s2713_s30 + $0x100] sm:$0xff] %v1687_v38  ;;  %v3006_v54 = vld [vmem:[#allocation13_spill] sm:$0xff]  ;;  %v3008_v22 = vld [vmem:[#allocation20_spill] sm:$0xff]  ;;  %v3009_v38 = vld [vmem:[#allocation22_spill] sm:$0xff] }
 0x33a   : > { %v1573_v16 = vadd.f32 %v1520_v53, %v1489_v42  ;;  %v2775_v63 = vadd.f32 %v1520_v53, %v1490_v48  ;;  %v1632_v58 = vmul.f32 0.01, %v1568_v8  ;;  %v1692_v5 = vmax.f32 %v1564_v25, %v1628_v14  ;;  %1752 = vst [vmem:[%s2713_s30 + $0x108] sm:$0xff] %v1688_v60  ;;  %v3007_v25 = vld [vmem:[#allocation16_spill] sm:$0xff] }
 0x33b   : > { %v1633_v29 = vmul.f32 0.01, %v1569_v7  ;;  %v1693_v21 = vmax.f32 %v1565_v37, %v1629_v13  ;;  %1753 = vst [vmem:[%s2713_s30 + $0x110] sm:$0xff] %v1689_v44  ;;  %v1634_v40 = vmul.f32 0.01, %v1570_v35  ;;  %v1694_v61 = vmax.f32 %v1566_v11, %v1630_v46  ;;  %v3010_v48 = vld [vmem:[#allocation24_spill] sm:$0xff] }
 0x33c   : > { %1754 = vst [vmem:[%s2713_s30 + $0x118] sm:$0xff] %v1690_v57  ;;  %v1491_v9 = vmul.f32 %v2773_v19, %v2376_v34  ;;  %v1635_v6 = vmul.f32 0.01, %v1571_v32  ;;  %v1636_v53 = vmul.f32 0.01, %v1572_v43  ;;  %v1695_v59 = vmax.f32 %v1567_v10, %v1631_v18  ;;  %v3012_v46 = vld [vmem:[#allocation26_spill] sm:$0xff] }
 0x33d   : > { %1755 = vst [vmem:[%s2713_s30 + $0x120] sm:$0xff] %v1691_v49  ;;  %v1492_v56 = vmul.f32 %v2773_v19, %v2378_v36  ;;  %v1637_v0 = vmul.f32 0.01, %v1573_v16  ;;  %v1638_v47 = vmul.f32 0.01, %v2775_v63  ;;  %v1696_v45 = vmax.f32 %v1568_v8, %v1632_v58  ;;  %v3013_v49 = vld [vmem:[#allocation27_spill] sm:$0xff] }
 0x33e   : > { %1756 = vst [vmem:[%s2713_s30 + $0x128] sm:$0xff] %v1692_v5  ;;  %v1493_v24 = vmul.f32 %v2773_v19, %v2411_v27  ;;  %v1697_v26 = vmax.f32 %v1569_v7, %v1633_v29  ;;  %v1494_v34 = vmul.f32 %v2773_v19, %v2418_v17  ;;  %v1575_v39 = vadd.f32 %v2780_v50, %v1491_v9  ;;  %v3011_v7 = vld [vmem:[#allocation25_spill] sm:$0xff]  ;;  %v3014_v29 = vld [vmem:[#allocation28_spill] sm:$0xff] }
 0x33f   : > { %1757 = vst [vmem:[%s2713_s30 + $0x130] sm:$0xff] %v1693_v21  ;;  %v1576_v36 = vadd.f32 %v2780_v50, %v1492_v56  ;;  %v1698_v31 = vmax.f32 %v1570_v35, %v1634_v40  ;;  %v1495_v2 = vmul.f32 %v2773_v19, %v3005_v41  ;;  %v1699_v27 = vmax.f32 %v1571_v32, %v1635_v6 }
 0x340   : > { %1758 = vst [vmem:[%s2713_s30 + $0x138] sm:$0xff] %v1694_v61  ;;  %v1577_v3 = vadd.f32 %v2780_v50, %v1493_v24  ;;  %v1700_v23 = vmax.f32 %v1572_v43, %v1636_v53  ;;  %v1496_v62 = vmul.f32 %v2773_v19, %v3006_v54  ;;  %v1578_v17 = vadd.f32 %v2780_v50, %v1494_v34  ;;  %v2851_v34 = vpop.permute.xlu0 %1514  ;;  %v3017_v54 = vld [vmem:[#allocation5_spill] sm:$0xff] }
 0x341   : > { %1759 = vst [vmem:[%s2713_s30 + $0x140] sm:$0xff] %v1695_v59  ;;  %v1701_v1 = vmax.f32 %v1573_v16, %v1637_v0  ;;  %v1702_v51 = vmax.f32 %v2775_v63, %v1638_v47  ;;  %v1497_v52 = vmul.f32 %v2773_v19, %v3007_v25  ;;  %v1579_v37 = vadd.f32 %v2780_v50, %v1495_v2  ;;  %v3016_v2 = vld [vmem:[#allocation4_spill] sm:$0xff] }
 0x342   : > { %1760 = vst [vmem:[%s2713_s30 + $0x148] sm:$0xff] %v1696_v45  ;;  %v1498_v30 = vmul.f32 %v2773_v19, %v2533_v15  ;;  %v1580_v4 = vadd.f32 %v2780_v50, %v1496_v62  ;;  %v1639_v33 = vmul.f32 0.01, %v1575_v39  ;;  %v1640_v11 = vmul.f32 0.01, %v1576_v36 }
 0x343   : > { %1761 = vst [vmem:[%s2713_s30 + $0x150] sm:$0xff] %v1697_v26  ;;  %v1499_v12 = vmul.f32 %v2773_v19, %v2555_v28  ;;  %v1500_v42 = vmul.f32 %v2773_v19, %v3008_v22  ;;  %v1581_v10 = vadd.f32 %v2780_v50, %v1497_v52  ;;  %v1641_v55 = vmul.f32 0.01, %v1577_v3 }
 0x344   : > { %1762 = vst [vmem:[%s2713_s30 + $0x158] sm:$0xff] %v1698_v31  ;;  %v1501_v15 = vmul.f32 %v2773_v19, %v3009_v38  ;;  %v1502_v8 = vmul.f32 %v2773_v19, %v3010_v48  ;;  %v1582_v14 = vadd.f32 %v2780_v50, %v1498_v30  ;;  %v1642_v60 = vmul.f32 0.01, %v1578_v17  ;;  %v3015_v31 = vld [vmem:[#allocation3_spill] sm:$0xff]  ;;  %v3021_v48 = vld [vmem:[#allocation9_spill] sm:$0xff] }
 0x345   : > { %1763 = vst [vmem:[%s2713_s30 + $0x160] sm:$0xff] %v1699_v27  ;;  %v1503_v28 = vmul.f32 %v2773_v19, %v3011_v7  ;;  %v1583_v13 = vadd.f32 %v2780_v50, %v1499_v12  ;;  %v1643_v44 = vmul.f32 0.01, %v1579_v37  ;;  %v1703_v35 = vmax.f32 %v1575_v39, %v1639_v33 }
 0x346   : > { %1764 = vst [vmem:[%s2713_s30 + $0x168] sm:$0xff] %v1700_v23  ;;  %v1504_v57 = vmul.f32 %v2773_v19, %v3012_v46  ;;  %v1584_v32 = vadd.f32 %v2780_v50, %v1500_v42  ;;  %v1644_v43 = vmul.f32 0.01, %v1580_v4  ;;  %v1704_v18 = vmax.f32 %v1576_v36, %v1640_v11  ;;  %v3020_v42 = vld [vmem:[#allocation8_spill] sm:$0xff]  ;;  %v3023_v46 = vld [vmem:[#allocation11_spill] sm:$0xff] }
 0x347   : > { %1765 = vst [vmem:[%s2713_s30 + $0x170] sm:$0xff] %v1701_v1  ;;  %v1505_v16 = vmul.f32 %v2773_v19, %v3013_v49  ;;  %v1585_v63 = vadd.f32 %v2780_v50, %v1501_v15  ;;  %v1645_v58 = vmul.f32 0.01, %v1581_v10  ;;  %v1705_v5 = vmax.f32 %v1577_v3, %v1641_v55  ;;  %v3018_v1 = vld [vmem:[#allocation6_spill] sm:$0xff] }
 0x348   : > { %1766 = vst [vmem:[%s2713_s30 + $0x178] sm:$0xff] %v1702_v51  ;;  %v1506_v21 = vmul.f32 %v2773_v19, %v3014_v29  ;;  %v1586_v40 = vadd.f32 %v2780_v50, %v1502_v8  ;;  %v1646_v61 = vmul.f32 0.01, %v1582_v14  ;;  %v1706_v9 = vmax.f32 %v1578_v17, %v1642_v60  ;;  %v3022_v60 = vld [vmem:[#allocation10_spill] sm:$0xff] }
 0x349   : > { %v1587_v6 = vadd.f32 %v2780_v50, %v1503_v28  ;;  %v2842_v53 = vadd.f32 %v2780_v50, %v1504_v57  ;;  %v1647_v59 = vmul.f32 0.01, %v1583_v13  ;;  %v1707_v56 = vmax.f32 %v1579_v37, %v1643_v44  ;;  %1767 = vst [vmem:[%s2713_s30 + $0x180] sm:$0xff] %v1703_v35  ;;  %v3024_v49 = vld [vmem:[#allocation14_spill] sm:$0xff] }
 0x34a   : > { %v1648_v0 = vmul.f32 0.01, %v1584_v32  ;;  %v1708_v47 = vmax.f32 %v1580_v4, %v1644_v43  ;;  %1768 = vst [vmem:[%s2713_s30 + $0x188] sm:$0xff] %v1704_v18  ;;  %v1589_v19 = vadd.f32 %v2780_v50, %v1505_v16  ;;  %v2848_v45 = vadd.f32 %v2780_v50, %v1506_v21  ;;  %v3019_v4 = vld [vmem:[#allocation7_spill] sm:$0xff] }
 0x34b   : > { %v1649_v24 = vmul.f32 0.01, %v1585_v63  ;;  %v1709_v26 = vmax.f32 %v1581_v10, %v1645_v58  ;;  %1769 = vst [vmem:[%s2713_s30 + $0x190] sm:$0xff] %v1705_v5  ;;  %v1650_v39 = vmul.f32 0.01, %v1586_v40  ;;  %v1710_v36 = vmax.f32 %v1582_v14, %v1646_v61  ;;  %v3025_v5 = vld [vmem:[#allocation15_spill] sm:$0xff] }
 0x34c   : > { %1770 = vst [vmem:[%s2713_s30 + $0x198] sm:$0xff] %v1706_v9  ;;  %v1459_v41 = vmul.f32 %v2742_v20, %v3015_v31  ;;  %v1460_v3 = vmul.f32 %v2742_v20, %v3016_v2  ;;  %v1651_v27 = vmul.f32 0.01, %v1587_v6  ;;  %v1652_v50 = vmul.f32 0.01, %v2842_v53  ;;  %v3026_v9 = vld [vmem:[#allocation17_spill] sm:$0xff] }
 0x34d   : > { %v1711_v23 = vmax.f32 %v1583_v13, %v1647_v59  ;;  %1771 = vst [vmem:[%s2713_s30 + $0x1a0] sm:$0xff] %v1707_v56  ;;  %v1461_v62 = vmul.f32 %v2742_v20, %v3017_v54  ;;  %v1712_v17 = vmax.f32 %v1584_v32, %v1648_v0  ;;  %v1462_v51 = vmul.f32 %v2742_v20, %v3018_v1  ;;  %v3027_v0 = vld [vmem:[#allocation18_spill] sm:$0xff]  ;;  %v3029_v2 = vld [vmem:[#allocation21_spill] sm:$0xff]  ;;  %v3030_v54 = vld [vmem:[#allocation23_spill] sm:$0xff] }
 0x34e   : > { %1772 = vst [vmem:[%s2713_s30 + $0x1a8] sm:$0xff] %v1708_v47  ;;  %v1543_v25 = vadd.f32 %v2851_v34, %v1459_v41  ;;  %v1544_v52 = vadd.f32 %v2851_v34, %v1460_v3  ;;  %v1653_v37 = vmul.f32 0.01, %v1589_v19  ;;  %v1713_v30 = vmax.f32 %v1585_v63, %v1649_v24 }
 0x34f   : > { %1773 = vst [vmem:[%s2713_s30 + $0x1b0] sm:$0xff] %v1709_v26  ;;  %v1463_v33 = vmul.f32 %v2742_v20, %v3019_v4  ;;  %v1545_v11 = vadd.f32 %v2851_v34, %v1461_v62  ;;  %v1654_v12 = vmul.f32 0.01, %v2848_v45  ;;  %v1714_v22 = vmax.f32 %v1586_v40, %v1650_v39  ;;  %v3028_v26 = vld [vmem:[#allocation19_spill] sm:$0xff] }
 0x350   : > { %1774 = vst [vmem:[%s2713_s30 + $0x1b8] sm:$0xff] %v1710_v36  ;;  %v1464_v10 = vmul.f32 %v2742_v20, %v3020_v42  ;;  %v1546_v55 = vadd.f32 %v2851_v34, %v1462_v51  ;;  %v1715_v38 = vmax.f32 %v1587_v6, %v1651_v27  ;;  %v1716_v15 = vmax.f32 %v2842_v53, %v1652_v50 }
 0x351   : > { %1775 = vst [vmem:[%s2713_s30 + $0x1c0] sm:$0xff] %v1711_v23  ;;  %v1465_v8 = vmul.f32 %v2742_v20, %v3021_v48  ;;  %v1547_v14 = vadd.f32 %v2851_v34, %v1463_v33  ;;  %v1466_v7 = vmul.f32 %v2742_v20, %v3022_v60  ;;  %v1607_v13 = vmul.f32 0.01, %v1543_v25 }
 0x352   : > { %1776 = vst [vmem:[%s2713_s30 + $0x1c8] sm:$0xff] %v1712_v17  ;;  %v1548_v28 = vadd.f32 %v2851_v34, %v1464_v10  ;;  %v1608_v44 = vmul.f32 0.01, %v1544_v52  ;;  %v1717_v35 = vmax.f32 %v1589_v19, %v1653_v37  ;;  %v1467_v57 = vmul.f32 %v2742_v20, %v3023_v46 }
 0x353   : > { %1777 = vst [vmem:[%s2713_s30 + $0x1d0] sm:$0xff] %v1713_v30  ;;  %v1549_v32 = vadd.f32 %v2851_v34, %v1465_v8  ;;  %v1609_v43 = vmul.f32 0.01, %v1545_v11  ;;  %v1718_v18 = vmax.f32 %v2848_v45, %v1654_v12  ;;  %v1468_v16 = vmul.f32 %v2742_v20, %v3024_v49 }
 0x354   : > { %1778 = vst [vmem:[%s2713_s30 + $0x1d8] sm:$0xff] %v1714_v22  ;;  %v1550_v63 = vadd.f32 %v2851_v34, %v1466_v7  ;;  %v1610_v58 = vmul.f32 0.01, %v1546_v55  ;;  %v1469_v29 = vmul.f32 %v2742_v20, %v3025_v5  ;;  %v1551_v21 = vadd.f32 %v2851_v34, %v1467_v57 }
 0x355   : > { %1779 = vst [vmem:[%s2713_s30 + $0x1e0] sm:$0xff] %v1715_v38  ;;  %v1611_v40 = vmul.f32 0.01, %v1547_v14  ;;  %v1671_v61 = vmax.f32 %v1543_v25, %v1607_v13  ;;  %v1470_v6 = vmul.f32 %v2742_v20, %v3026_v9  ;;  %v1552_v53 = vadd.f32 %v2851_v34, %v1468_v16 }
 0x356   : > { %1780 = vst [vmem:[%s2713_s30 + $0x1e8] sm:$0xff] %v1716_v15  ;;  %v1612_v59 = vmul.f32 0.01, %v1548_v28  ;;  %v1672_v56 = vmax.f32 %v1544_v52, %v1608_v44  ;;  %v1471_v47 = vmul.f32 %v2742_v20, %v3027_v0  ;;  %v1553_v19 = vadd.f32 %v2851_v34, %v1469_v29 }
 0x357   : > { %1781 = vst [vmem:[%s2713_s30 + $0x1f0] sm:$0xff] %v1717_v35  ;;  %v1613_v45 = vmul.f32 0.01, %v1549_v32  ;;  %v1673_v24 = vmax.f32 %v1545_v11, %v1609_v43  ;;  %v1472_v39 = vmul.f32 %v2742_v20, %v3028_v26  ;;  %v1554_v36 = vadd.f32 %v2851_v34, %v1470_v6 }
 0x358   : > { %1782 = vst [vmem:[%s2713_s30 + $0x1f8] sm:$0xff] %v1718_v18  ;;  %v1614_v31 = vmul.f32 0.01, %v1550_v63  ;;  %v1674_v41 = vmax.f32 %v1546_v55, %v1610_v58  ;;  %v1473_v3 = vmul.f32 %v2742_v20, %v3029_v2  ;;  %v1555_v27 = vadd.f32 %v2851_v34, %v1471_v47 }
 0x359   : > { %v1615_v50 = vmul.f32 0.01, %v1551_v21  ;;  %v1675_v23 = vmax.f32 %v1547_v14, %v1611_v40  ;;  %1735 = vst [vmem:[%s2713_s30 + $0x80] sm:$0xff] %v1671_v61  ;;  %v1474_v62 = vmul.f32 %v2742_v20, %v3030_v54  ;;  %v1556_v17 = vadd.f32 %v2851_v34, %v1472_v39 }
 0x35a   : > { %v1616_v1 = vmul.f32 0.01, %v1552_v53  ;;  %v1676_v51 = vmax.f32 %v1548_v28, %v1612_v59  ;;  %1736 = vst [vmem:[%s2713_s30 + $0x88] sm:$0xff] %v1672_v56  ;;  %v1557_v25 = vadd.f32 %v2851_v34, %v1473_v3  ;;  %v1617_v52 = vmul.f32 0.01, %v1553_v19 }
 0x35b   : > { %v1677_v37 = vmax.f32 %v1549_v32, %v1613_v45  ;;  %1737 = vst [vmem:[%s2713_s30 + $0x90] sm:$0xff] %v1673_v24  ;;  %v1558_v30 = vadd.f32 %v2851_v34, %v1474_v62  ;;  %v1618_v4 = vmul.f32 0.01, %v1554_v36  ;;  %v1678_v33 = vmax.f32 %v1550_v63, %v1614_v31 }
 0x35c   : > { %1738 = vst [vmem:[%s2713_s30 + $0x98] sm:$0xff] %v1674_v41  ;;  %v1619_v20 = vmul.f32 0.01, %v1555_v27  ;;  %v1679_v11 = vmax.f32 %v1551_v21, %v1615_v50  ;;  %v1620_v12 = vmul.f32 0.01, %v1556_v17  ;;  %v1680_v22 = vmax.f32 %v1552_v53, %v1616_v1 }
 0x35d   : > { %1739 = vst [vmem:[%s2713_s30 + $0xa0] sm:$0xff] %v1675_v23  ;;  %v1621_v42 = vmul.f32 0.01, %v1557_v25  ;;  %v1681_v10 = vmax.f32 %v1553_v19, %v1617_v52  ;;  %v1622_v34 = vmul.f32 0.01, %v1558_v30  ;;  %v1682_v55 = vmax.f32 %v1554_v36, %v1618_v4 }
 0x35e   : > { %1740 = vst [vmem:[%s2713_s30 + $0xa8] sm:$0xff] %v1676_v51  ;;  %v1683_v38 = vmax.f32 %v1555_v27, %v1619_v20  ;;  %v1684_v15 = vmax.f32 %v1556_v17, %v1620_v12 }
 0x35f   : > { %1741 = vst [vmem:[%s2713_s30 + $0xb0] sm:$0xff] %v1677_v37  ;;  %v1685_v48 = vmax.f32 %v1557_v25, %v1621_v42  ;;  %v1686_v8 = vmax.f32 %v1558_v30, %v1622_v34 }
 0x360   : > { %1742 = vst [vmem:[%s2713_s30 + $0xb8] sm:$0xff] %v1678_v33 }
 0x361   : > { %1743 = vst [vmem:[%s2713_s30 + $0xc0] sm:$0xff] %v1679_v11 }
 0x362   : > { %1744 = vst [vmem:[%s2713_s30 + $0xc8] sm:$0xff] %v1680_v22 }
 0x363   : > { %1745 = vst [vmem:[%s2713_s30 + $0xd0] sm:$0xff] %v1681_v10 }
 0x364   : > { %1746 = vst [vmem:[%s2713_s30 + $0xd8] sm:$0xff] %v1682_v55 }
 0x365   : > { %1747 = vst [vmem:[%s2713_s30 + $0xe0] sm:$0xff] %v1683_v38 }
 0x366   : > { %1748 = vst [vmem:[%s2713_s30 + $0xe8] sm:$0xff] %v1684_v15 }
 0x367   : > { %1749 = vst [vmem:[%s2713_s30 + $0xf0] sm:$0xff] %v1685_v48 }
 0x368   : > { %1750 = vst [vmem:[%s2713_s30 + $0xf8] sm:$0xff] %v1686_v8 }
 0x369 PF: > { %s19_s11 = sadd.s32 1, %s1998_s11   ;;  %s3031_s30 = smov %s1994_s10 }
 0x36a   : > { %p16_p5 = scmp.ge.s32.totalorder %s19_s11, 4   ;;  %s3032_s10 = smov %s3034_s12 }
 0x36c   :  { %18 = sbr.rel (!%p16_p5) target bundleno = 2 (0x2), region = 95 }

</bundles_post_ra>
